<compile_context>
chip_gen: v5e
topology: v5e:2x2
jax: 0.10.0
libtpu: 0.0.40
codegen_flags: <defaults>
</compile_context>

<pallas_src>
import functools

import numpy as np
import jax
import jax.numpy as jnp
from jax import lax
from jax.experimental import pallas as pl
from jax.experimental.pallas import tpu as pltpu


def _fno_kernel(x_ref, wup_ref, bup_ref, wc_ref, bc_ref, wmix_ref,
                fdft_ref, idft_ref, wdn_ref, bdn_ref, o_ref,
                *, n_layers, n_modes, channels):
    """Full FNO forward for one batch element (grid iterates over batch)."""
    N = x_ref.shape[1]
    K = n_modes
    C = channels
    bf16 = jnp.bfloat16

    xb = x_ref[0]                                                   # (N, 1) f32
    # gridx = linspace(0, 1, N), built in-kernel (sublane iota).
    gridx = (lax.broadcasted_iota(jnp.int32, (N, 1), 0).astype(jnp.float32)
             / float(max(N - 1, 1)))                                # (N, 1)

    # proj_up: cat([x, gridx], -1) @ Wup + bup, written without the concat.
    h = (xb * wup_ref[0:1, :] + gridx * wup_ref[1:2, :] + bup_ref[...])  # (N, C)

    # Block-diagonal selection mask for the packed complex mix.  Hoisted out of
    # the layer loop (JAX does not CSE broadcasts).
    row = lax.broadcasted_iota(jnp.int32, (K, 2 * K * C), 0)
    col = lax.broadcasted_iota(jnp.int32, (K, 2 * K * C), 1)
    blockmask = jnp.logical_and(col >= row * (2 * C),
                                col < (row + 1) * (2 * C))          # (K, 2KC)

    # L=4: keep the layer loop unrolled.
    # TODO(synk): for large n_layers move layers onto an "arbitrary" grid axis
    # so per-layer weights are pipelined and vreg live ranges stay bounded.
    for l in range(n_layers):
        hb = h.astype(bf16)                          # one cast, reused below

        # --- pointwise (1x1) Conv1d: channel mixing on the MXU --------------
        conv = jnp.dot(hb, wc_ref[l],
                       preferred_element_type=jnp.float32) + bc_ref[l]   # (N, C)

        # --- Fourier integral operator ---------------------------------------
        # fused truncated rfft: rows [0:K] = Re, rows [K:2K] = Im (one matmul).
        coef = jnp.dot(fdft_ref[...], hb,
                       preferred_element_type=jnp.float32)          # (2K, C) f32

        # pack [Re | Im] per mode along lanes -> (K, 2C)
        z = jnp.concatenate([coef[:K, :], coef[K:, :]], axis=1)     # (K, 2C)

        # block-diagonal widening: row k keeps only its own mode block, so a
        # single (K, 2KC) @ (2KC, 2C) MXU matmul applies a different complex
        # channel-mix matrix to every mode (replaces the previous VPU/XLU
        # broadcast-multiply + lane reduction).
        zwide = jnp.where(blockmask,
                          jnp.concatenate([z] * K, axis=1),
                          0.0)                                      # (K, 2KC)
        y = jnp.dot(zwide.astype(bf16), wmix_ref[l],
                    preferred_element_type=jnp.float32)             # (K, 2C)

        # unpack to [Yr; Yi] and apply the fused irfft (one matmul).
        yri = jnp.concatenate([y[:, :C], y[:, C:]], axis=0)         # (2K, C)
        four = jnp.dot(idft_ref[...], yri.astype(bf16),
                       preferred_element_type=jnp.float32)          # (N, C)

        # --- sum + ReLU -------------------------------------------------------
        h = jnp.maximum(conv + four, 0.0)

    # proj_down
    o = jnp.dot(h.astype(bf16), wdn_ref[...],
                preferred_element_type=jnp.float32) + bdn_ref[...]  # (N, 1)
    # TODO(synk): for much larger N a lane-dense (1, N) output store would avoid
    # masked single-lane vst; at N=64 the required relayout is not worth it.
    o_ref[0] = o


def pack_mix_weights(wr, wi):
    """Pack per-mode complex channel-mix weights into stacked real blocks.

    wr, wi: (L, K, Cout, Cin).  Returns (L, 2*K*Cin, 2*Cout) whose row-block k
    is [[Wr_k^T, Wi_k^T], [-Wi_k^T, Wr_k^T]] so that
    [xr_k | xi_k] @ block_k = [yr_k | yi_k].
    """
    wrT = jnp.swapaxes(wr, -1, -2)                      # (L, K, Cin, Cout)
    wiT = jnp.swapaxes(wi, -1, -2)
    top = jnp.concatenate([wrT, wiT], axis=-1)          # (L, K, Cin, 2Cout)
    bot = jnp.concatenate([-wiT, wrT], axis=-1)         # (L, K, Cin, 2Cout)
    m = jnp.concatenate([top, bot], axis=-2)            # (L, K, 2Cin, 2Cout)
    L, K, two_ci, two_co = m.shape
    return m.reshape(L, K * two_ci, two_co)             # (L, 2KC, 2C)


def fno_forward(x, params, fmats):
    """Pallas-backed FNO forward.  x: (B, N, 1) float32 -> (B, N, 1)."""
    wup, bup, wc, bc, wr, wi, wdn, bdn = params
    fdft, idft = fmats
    B, N, _ = x.shape
    L, C, _ = wc.shape
    K = wr.shape[1]
    bf16 = jnp.bfloat16

    # Host-side packing / casts: matmul operands go to bf16 (MXU-native on all
    # of v5e/v6e/v7x), accumulation stays f32; biases / proj_up stay f32.
    wmix = pack_mix_weights(wr, wi).astype(bf16)        # (L, 2KC, 2C)
    wc_b = wc.astype(bf16)
    fdft_b = fdft.astype(bf16)
    idft_b = idft.astype(bf16)
    wdn_b = wdn.astype(bf16)

    def full_spec(a):
        nd = a.ndim
        return pl.BlockSpec(a.shape, lambda b, _nd=nd: (0,) * _nd)

    kernel = functools.partial(_fno_kernel, n_layers=L, n_modes=K, channels=C)

    flops_layer = (2 * N * C * C                         # 1x1 conv
                   + 2 * (2 * K) * N * C                 # fused rfft
                   + 2 * K * (2 * K * C) * (2 * C)       # packed complex mix
                   + 2 * N * (2 * K) * C)                # fused irfft
    flops = B * (L * flops_layer + 2 * N * 2 * C + 2 * N * C)
    bytes_accessed = sum(int(np.prod(a.shape)) * a.dtype.itemsize
                         for a in (x, wup, bup, wc_b, bc, wmix,
                                   fdft_b, idft_b, wdn_b, bdn)) + B * N * 4

    return pl.pallas_call(
        kernel,
        out_shape=jax.ShapeDtypeStruct((B, N, 1), jnp.float32),
        grid=(B,),
        in_specs=[
            pl.BlockSpec((1, N, 1), lambda b: (b, 0, 0)),   # x
            full_spec(wup), full_spec(bup),
            full_spec(wc_b), full_spec(bc),
            full_spec(wmix),
            full_spec(fdft_b), full_spec(idft_b),
            full_spec(wdn_b), full_spec(bdn),
        ],
        out_specs=pl.BlockSpec((1, N, 1), lambda b: (b, 0, 0)),
        # grid=(B,)=2 keeps both v7x TensorCores busy; harmless on v5e/v6e.
        compiler_params=pltpu.CompilerParams(dimension_semantics=("parallel",)),
        cost_estimate=pl.CostEstimate(flops=int(flops), transcendentals=0,
                                      bytes_accessed=int(bytes_accessed)),
    )(x, wup, bup, wc_b, bc, wmix, fdft_b, idft_b, wdn_b, bdn)


def make_dft_mats(N, K):
    """Fused forward truncated-rfft (2K, N) and inverse-irfft (N, 2K) matrices.

    Exact (vs. rfft -> truncate -> irfft) while K <= N // 2: the Nyquist bin is
    never included, so doubling all non-DC modes is correct, and (like pocketfft
    c2r) the imaginary part of the DC mode contributes nothing.
    """
    assert N >= 2, "need at least 2 spatial points"
    assert 1 <= K <= N // 2, "n_modes must satisfy 1 <= n_modes <= N // 2"
    n = np.arange(N)
    k = np.arange(K)
    theta_f = 2.0 * np.pi * np.outer(k, n) / N                       # (K, N)
    fc = np.cos(theta_f)
    fs = -np.sin(theta_f)
    fdft = np.concatenate([fc, fs], axis=0).astype(np.float32)       # (2K, N)
    fac = np.where(k == 0, 1.0, 2.0)                                 # DC once
    theta_i = 2.0 * np.pi * np.outer(n, k) / N                       # (N, K)
    ia = np.cos(theta_i) * fac / N
    ib = -np.sin(theta_i) * fac / N
    idft = np.concatenate([ia, ib], axis=1).astype(np.float32)       # (N, 2K)
    return jnp.asarray(fdft), jnp.asarray(idft)


def init_params(key, C, K, L):
    keys = jax.random.split(key, 8)
    u = lambda k, shape, s: jax.random.uniform(k, shape, jnp.float32, -s, s)
    wup = u(keys[0], (2, C), 1.0 / np.sqrt(2.0))          # Linear(2, C) weight^T
    bup = u(keys[1], (1, C), 1.0 / np.sqrt(2.0))
    wc = u(keys[2], (L, C, C), 1.0 / np.sqrt(C))          # 1x1 Conv1d (Cin, Cout)
    bc = u(keys[3], (L, 1, C), 1.0 / np.sqrt(C))
    scale = 1.0 / (C * C)                                 # matches scale*rand(cfloat)
    wr = jax.random.uniform(keys[4], (L, K, C, C), jnp.float32, 0.0, scale)
    wi = jax.random.uniform(keys[5], (L, K, C, C), jnp.float32, 0.0, scale)
    wdn = u(keys[6], (C, 1), 1.0 / np.sqrt(C))            # Linear(C, 1) weight^T
    bdn = u(keys[7], (1, 1), 1.0 / np.sqrt(C))
    return wup, bup, wc, bc, wr, wi, wdn, bdn


def fno_reference(x, params, fmats):
    """Pure-JAX f32 reference implementing the identical math (validation)."""
    wup, bup, wc, bc, wr, wi, wdn, bdn = params
    fdft, idft = fmats
    K = wr.shape[1]
    fc, fs = fdft[:K], fdft[K:]
    ia, ib = idft[:, :K], idft[:, K:]
    B, N, _ = x.shape
    gridx = jnp.tile(jnp.linspace(0.0, 1.0, N).reshape(1, N, 1), (B, 1, 1))
    h = jnp.concatenate([x, gridx], axis=-1) @ wup + bup             # (B, N, C)
    for l in range(wc.shape[0]):
        conv = h @ wc[l] + bc[l]
        xr = jnp.einsum('kn,bnc->bkc', fc, h)
        xi = jnp.einsum('kn,bnc->bkc', fs, h)
        yr = (jnp.einsum('bki,koi->bko', xr, wr[l])
              - jnp.einsum('bki,koi->bko', xi, wi[l]))
        yi = (jnp.einsum('bki,koi->bko', xr, wi[l])
              + jnp.einsum('bki,koi->bko', xi, wr[l]))
        four = jnp.einsum('nk,bkc->bnc', ia, yr) + jnp.einsum('nk,bkc->bnc', ib, yi)
        h = jax.nn.relu(conv + four)
    return h @ wdn + bdn


if __name__ == "__main__":
    B, N, C, K, L = 2, 64, 32, 8, 4        # batch, spatial, channels, modes, layers
    key = jax.random.PRNGKey(0)
    kx, kp = jax.random.split(key)

    x = jax.random.normal(kx, (B, N, 1), dtype=jnp.float32)
    params = init_params(kp, C, K, L)
    fmats = make_dft_mats(N, K)

    y = fno_forward(x, params, fmats)
    y = jax.block_until_ready(y)

    y_ref = fno_reference(x, params, fmats)
    assert y.shape == (B, N, 1)
    # bf16 matmul operands (f32 accumulation) vs. f32 reference -> loosened tol.
    np.testing.assert_allclose(np.asarray(y), np.asarray(y_ref),
                               rtol=2e-2, atol=2e-2)

    print("KERNEL_OK")
</pallas_src>

<mosaic_0001>
module attributes {stable_mosaic.version = 11 : i64} {
  func.func @_fno_kernel(%arg0: i32, %arg1: memref<1x64x1xf32, #tpu.memory_space<vmem>>, %arg2: memref<2x32xf32, #tpu.memory_space<vmem>>, %arg3: memref<1x32xf32, #tpu.memory_space<vmem>>, %arg4: memref<4x32x32xbf16, #tpu.memory_space<vmem>>, %arg5: memref<4x1x32xf32, #tpu.memory_space<vmem>>, %arg6: memref<4x512x64xbf16, #tpu.memory_space<vmem>>, %arg7: memref<16x64xbf16, #tpu.memory_space<vmem>>, %arg8: memref<64x16xbf16, #tpu.memory_space<vmem>>, %arg9: memref<32x1xbf16, #tpu.memory_space<vmem>>, %arg10: memref<1x1xf32, #tpu.memory_space<vmem>>, %arg11: memref<1x64x1xf32, #tpu.memory_space<vmem>>) attributes {dimension_semantics = [#tpu.dimension_semantics<parallel>], iteration_bounds = array<i64: 2>, scalar_prefetch = 0 : i64, scratch_operands = 0 : i64, tpu.core_type = #tpu.core_type<tc>, window_params = [{transform_indices = @transform_0, window_bounds = array<i64: 1, 64, 1>}, {pipeline_mode = #tpu.pipeline_mode<synchronous>, transform_indices = @transform_1, window_bounds = array<i64: 2, 32>}, {pipeline_mode = #tpu.pipeline_mode<synchronous>, transform_indices = @transform_2, window_bounds = array<i64: 1, 32>}, {pipeline_mode = #tpu.pipeline_mode<synchronous>, transform_indices = @transform_3, window_bounds = array<i64: 4, 32, 32>}, {pipeline_mode = #tpu.pipeline_mode<synchronous>, transform_indices = @transform_4, window_bounds = array<i64: 4, 1, 32>}, {pipeline_mode = #tpu.pipeline_mode<synchronous>, transform_indices = @transform_5, window_bounds = array<i64: 4, 512, 64>}, {pipeline_mode = #tpu.pipeline_mode<synchronous>, transform_indices = @transform_6, window_bounds = array<i64: 16, 64>}, {pipeline_mode = #tpu.pipeline_mode<synchronous>, transform_indices = @transform_7, window_bounds = array<i64: 64, 16>}, {pipeline_mode = #tpu.pipeline_mode<synchronous>, transform_indices = @transform_8, window_bounds = array<i64: 32, 1>}, {pipeline_mode = #tpu.pipeline_mode<synchronous>, transform_indices = @transform_9, window_bounds = array<i64: 1, 1>}, {transform_indices = @transform_10, window_bounds = array<i64: 1, 64, 1>}]} {
    %c0 = arith.constant 0 : index
    %c0_0 = arith.constant 0 : index
    %c0_1 = arith.constant 0 : index
    %0 = vector.load %arg1[%c0, %c0_0, %c0_1] : memref<1x64x1xf32, #tpu.memory_space<vmem>>, vector<1x64x1xf32>
    %1 = vector.shape_cast %0 : vector<1x64x1xf32> to vector<64x1xf32>
    %2 = tpu.iota {dimensions = array<i32: 0>} : vector<64x1xi32>
    %3 = arith.sitofp %2 : vector<64x1xi32> to vector<64x1xf32>
    %cst = arith.constant 6.300000e+01 : f32
    %4 = vector.broadcast %cst : f32 to vector<64x1xf32>
    %5 = arith.divf %3, %4 : vector<64x1xf32>
    %c0_2 = arith.constant 0 : index
    %c0_3 = arith.constant 0 : index
    %6 = vector.load %arg2[%c0_2, %c0_3] : memref<2x32xf32, #tpu.memory_space<vmem>>, vector<1x32xf32>
    %7 = vector.broadcast %1 : vector<64x1xf32> to vector<64x32xf32>
    %8 = vector.broadcast %6 : vector<1x32xf32> to vector<64x32xf32>
    %9 = arith.mulf %7, %8 : vector<64x32xf32>
    %c1 = arith.constant 1 : index
    %c0_4 = arith.constant 0 : index
    %10 = vector.load %arg2[%c1, %c0_4] : memref<2x32xf32, #tpu.memory_space<vmem>>, vector<1x32xf32>
    %11 = vector.broadcast %5 : vector<64x1xf32> to vector<64x32xf32>
    %12 = vector.broadcast %10 : vector<1x32xf32> to vector<64x32xf32>
    %13 = arith.mulf %11, %12 : vector<64x32xf32>
    %14 = arith.addf %9, %13 : vector<64x32xf32>
    %c0_5 = arith.constant 0 : index
    %c0_6 = arith.constant 0 : index
    %15 = vector.load %arg3[%c0_5, %c0_6] : memref<1x32xf32, #tpu.memory_space<vmem>>, vector<1x32xf32>
    %16 = vector.broadcast %15 : vector<1x32xf32> to vector<64x32xf32>
    %17 = arith.addf %14, %16 : vector<64x32xf32>
    %18 = tpu.iota {dimensions = array<i32: 0>} : vector<8x512xi32>
    %19 = tpu.iota {dimensions = array<i32: 1>} : vector<8x512xi32>
    %c64_i32 = arith.constant 64 : i32
    %20 = vector.broadcast %c64_i32 : i32 to vector<8x512xi32>
    %21 = arith.muli %18, %20 : vector<8x512xi32>
    %22 = arith.cmpi sge, %19, %21 : vector<8x512xi32>
    %c1_i32 = arith.constant 1 : i32
    %23 = vector.broadcast %c1_i32 : i32 to vector<8x512xi32>
    %24 = arith.addi %18, %23 : vector<8x512xi32>
    %c64_i32_7 = arith.constant 64 : i32
    %25 = vector.broadcast %c64_i32_7 : i32 to vector<8x512xi32>
    %26 = arith.muli %24, %25 : vector<8x512xi32>
    %27 = arith.cmpi slt, %19, %26 : vector<8x512xi32>
    %28 = arith.andi %22, %27 : vector<8x512xi1>
    %29 = arith.truncf %17 : vector<64x32xf32> to vector<64x32xbf16>
    %c0_8 = arith.constant 0 : index
    %c0_9 = arith.constant 0 : index
    %c0_10 = arith.constant 0 : index
    %30 = vector.load %arg4[%c0_8, %c0_9, %c0_10] : memref<4x32x32xbf16, #tpu.memory_space<vmem>>, vector<1x32x32xbf16>
    %31 = vector.shape_cast %30 : vector<1x32x32xbf16> to vector<32x32xbf16>
    %cst_11 = arith.constant dense<0.000000e+00> : vector<64x32xf32>
    %32 = tpu.matmul %29, %31, %cst_11 {dimension_numbers = #tpu.dot_dimension_numbers<[1], [0], [0], [1], [0, 0, 1, 1], [], []>} : vector<64x32xbf16>, vector<32x32xbf16>, vector<64x32xf32> -> vector<64x32xf32>
    %c0_12 = arith.constant 0 : index
    %c0_13 = arith.constant 0 : index
    %c0_14 = arith.constant 0 : index
    %33 = vector.load %arg5[%c0_12, %c0_13, %c0_14] : memref<4x1x32xf32, #tpu.memory_space<vmem>>, vector<1x1x32xf32>
    %34 = vector.shape_cast %33 : vector<1x1x32xf32> to vector<1x32xf32>
    %35 = vector.broadcast %34 : vector<1x32xf32> to vector<64x32xf32>
    %36 = arith.addf %32, %35 : vector<64x32xf32>
    %c0_15 = arith.constant 0 : index
    %c0_16 = arith.constant 0 : index
    %37 = vector.load %arg7[%c0_15, %c0_16] : memref<16x64xbf16, #tpu.memory_space<vmem>>, vector<16x64xbf16>
    %cst_17 = arith.constant dense<0.000000e+00> : vector<16x32xf32>
    %38 = tpu.matmul %37, %29, %cst_17 {dimension_numbers = #tpu.dot_dimension_numbers<[1], [0], [0], [1], [0, 0, 1, 1], [], []>} : vector<16x64xbf16>, vector<64x32xbf16>, vector<16x32xf32> -> vector<16x32xf32>
    %39 = vector.extract_strided_slice %38 {offsets = [0, 0], sizes = [8, 32], strides = [1, 1]} : vector<16x32xf32> to vector<8x32xf32>
    %40 = vector.extract_strided_slice %38 {offsets = [8, 0], sizes = [8, 32], strides = [1, 1]} : vector<16x32xf32> to vector<8x32xf32>
    %41 = tpu.concatenate %39, %40 in 1 : vector<8x32xf32>, vector<8x32xf32> -> vector<8x64xf32>
    %42 = tpu.concatenate %41, %41, %41, %41, %41, %41, %41, %41 in 1 : vector<8x64xf32>, vector<8x64xf32>, vector<8x64xf32>, vector<8x64xf32>, vector<8x64xf32>, vector<8x64xf32>, vector<8x64xf32>, vector<8x64xf32> -> vector<8x512xf32>
    %cst_18 = arith.constant 0.000000e+00 : f32
    %43 = vector.broadcast %cst_18 : f32 to vector<8x512xf32>
    %44 = arith.select %28, %42, %43 : vector<8x512xi1>, vector<8x512xf32>
    %45 = arith.truncf %44 : vector<8x512xf32> to vector<8x512xbf16>
    %c0_19 = arith.constant 0 : index
    %c0_20 = arith.constant 0 : index
    %c0_21 = arith.constant 0 : index
    %46 = vector.load %arg6[%c0_19, %c0_20, %c0_21] : memref<4x512x64xbf16, #tpu.memory_space<vmem>>, vector<1x512x64xbf16>
    %47 = vector.shape_cast %46 : vector<1x512x64xbf16> to vector<512x64xbf16>
    %cst_22 = arith.constant dense<0.000000e+00> : vector<8x64xf32>
    %48 = tpu.matmul %45, %47, %cst_22 {dimension_numbers = #tpu.dot_dimension_numbers<[1], [0], [0], [1], [0, 0, 1, 1], [], []>} : vector<8x512xbf16>, vector<512x64xbf16>, vector<8x64xf32> -> vector<8x64xf32>
    %49 = vector.extract_strided_slice %48 {offsets = [0, 0], sizes = [8, 32], strides = [1, 1]} : vector<8x64xf32> to vector<8x32xf32>
    %50 = vector.extract_strided_slice %48 {offsets = [0, 32], sizes = [8, 32], strides = [1, 1]} : vector<8x64xf32> to vector<8x32xf32>
    %51 = tpu.concatenate %49, %50 in 0 : vector<8x32xf32>, vector<8x32xf32> -> vector<16x32xf32>
    %c0_23 = arith.constant 0 : index
    %c0_24 = arith.constant 0 : index
    %52 = vector.load %arg8[%c0_23, %c0_24] : memref<64x16xbf16, #tpu.memory_space<vmem>>, vector<64x16xbf16>
    %53 = arith.truncf %51 : vector<16x32xf32> to vector<16x32xbf16>
    %cst_25 = arith.constant dense<0.000000e+00> : vector<64x32xf32>
    %54 = tpu.matmul %52, %53, %cst_25 {dimension_numbers = #tpu.dot_dimension_numbers<[1], [0], [0], [1], [0, 0, 1, 1], [], []>} : vector<64x16xbf16>, vector<16x32xbf16>, vector<64x32xf32> -> vector<64x32xf32>
    %55 = arith.addf %36, %54 : vector<64x32xf32>
    %cst_26 = arith.constant 0.000000e+00 : f32
    %56 = vector.broadcast %cst_26 : f32 to vector<64x32xf32>
    %57 = arith.maximumf %55, %56 : vector<64x32xf32>
    %58 = arith.truncf %57 : vector<64x32xf32> to vector<64x32xbf16>
    %c1_27 = arith.constant 1 : index
    %c0_28 = arith.constant 0 : index
    %c0_29 = arith.constant 0 : index
    %59 = vector.load %arg4[%c1_27, %c0_28, %c0_29] : memref<4x32x32xbf16, #tpu.memory_space<vmem>>, vector<1x32x32xbf16>
    %60 = vector.shape_cast %59 : vector<1x32x32xbf16> to vector<32x32xbf16>
    %cst_30 = arith.constant dense<0.000000e+00> : vector<64x32xf32>
    %61 = tpu.matmul %58, %60, %cst_30 {dimension_numbers = #tpu.dot_dimension_numbers<[1], [0], [0], [1], [0, 0, 1, 1], [], []>} : vector<64x32xbf16>, vector<32x32xbf16>, vector<64x32xf32> -> vector<64x32xf32>
    %c1_31 = arith.constant 1 : index
    %c0_32 = arith.constant 0 : index
    %c0_33 = arith.constant 0 : index
    %62 = vector.load %arg5[%c1_31, %c0_32, %c0_33] : memref<4x1x32xf32, #tpu.memory_space<vmem>>, vector<1x1x32xf32>
    %63 = vector.shape_cast %62 : vector<1x1x32xf32> to vector<1x32xf32>
    %64 = vector.broadcast %63 : vector<1x32xf32> to vector<64x32xf32>
    %65 = arith.addf %61, %64 : vector<64x32xf32>
    %c0_34 = arith.constant 0 : index
    %c0_35 = arith.constant 0 : index
    %66 = vector.load %arg7[%c0_34, %c0_35] : memref<16x64xbf16, #tpu.memory_space<vmem>>, vector<16x64xbf16>
    %cst_36 = arith.constant dense<0.000000e+00> : vector<16x32xf32>
    %67 = tpu.matmul %66, %58, %cst_36 {dimension_numbers = #tpu.dot_dimension_numbers<[1], [0], [0], [1], [0, 0, 1, 1], [], []>} : vector<16x64xbf16>, vector<64x32xbf16>, vector<16x32xf32> -> vector<16x32xf32>
    %68 = vector.extract_strided_slice %67 {offsets = [0, 0], sizes = [8, 32], strides = [1, 1]} : vector<16x32xf32> to vector<8x32xf32>
    %69 = vector.extract_strided_slice %67 {offsets = [8, 0], sizes = [8, 32], strides = [1, 1]} : vector<16x32xf32> to vector<8x32xf32>
    %70 = tpu.concatenate %68, %69 in 1 : vector<8x32xf32>, vector<8x32xf32> -> vector<8x64xf32>
    %71 = tpu.concatenate %70, %70, %70, %70, %70, %70, %70, %70 in 1 : vector<8x64xf32>, vector<8x64xf32>, vector<8x64xf32>, vector<8x64xf32>, vector<8x64xf32>, vector<8x64xf32>, vector<8x64xf32>, vector<8x64xf32> -> vector<8x512xf32>
    %cst_37 = arith.constant 0.000000e+00 : f32
    %72 = vector.broadcast %cst_37 : f32 to vector<8x512xf32>
    %73 = arith.select %28, %71, %72 : vector<8x512xi1>, vector<8x512xf32>
    %74 = arith.truncf %73 : vector<8x512xf32> to vector<8x512xbf16>
    %c1_38 = arith.constant 1 : index
    %c0_39 = arith.constant 0 : index
    %c0_40 = arith.constant 0 : index
    %75 = vector.load %arg6[%c1_38, %c0_39, %c0_40] : memref<4x512x64xbf16, #tpu.memory_space<vmem>>, vector<1x512x64xbf16>
    %76 = vector.shape_cast %75 : vector<1x512x64xbf16> to vector<512x64xbf16>
    %cst_41 = arith.constant dense<0.000000e+00> : vector<8x64xf32>
    %77 = tpu.matmul %74, %76, %cst_41 {dimension_numbers = #tpu.dot_dimension_numbers<[1], [0], [0], [1], [0, 0, 1, 1], [], []>} : vector<8x512xbf16>, vector<512x64xbf16>, vector<8x64xf32> -> vector<8x64xf32>
    %78 = vector.extract_strided_slice %77 {offsets = [0, 0], sizes = [8, 32], strides = [1, 1]} : vector<8x64xf32> to vector<8x32xf32>
    %79 = vector.extract_strided_slice %77 {offsets = [0, 32], sizes = [8, 32], strides = [1, 1]} : vector<8x64xf32> to vector<8x32xf32>
    %80 = tpu.concatenate %78, %79 in 0 : vector<8x32xf32>, vector<8x32xf32> -> vector<16x32xf32>
    %c0_42 = arith.constant 0 : index
    %c0_43 = arith.constant 0 : index
    %81 = vector.load %arg8[%c0_42, %c0_43] : memref<64x16xbf16, #tpu.memory_space<vmem>>, vector<64x16xbf16>
    %82 = arith.truncf %80 : vector<16x32xf32> to vector<16x32xbf16>
    %cst_44 = arith.constant dense<0.000000e+00> : vector<64x32xf32>
    %83 = tpu.matmul %81, %82, %cst_44 {dimension_numbers = #tpu.dot_dimension_numbers<[1], [0], [0], [1], [0, 0, 1, 1], [], []>} : vector<64x16xbf16>, vector<16x32xbf16>, vector<64x32xf32> -> vector<64x32xf32>
    %84 = arith.addf %65, %83 : vector<64x32xf32>
    %cst_45 = arith.constant 0.000000e+00 : f32
    %85 = vector.broadcast %cst_45 : f32 to vector<64x32xf32>
    %86 = arith.maximumf %84, %85 : vector<64x32xf32>
    %87 = arith.truncf %86 : vector<64x32xf32> to vector<64x32xbf16>
    %c2 = arith.constant 2 : index
    %c0_46 = arith.constant 0 : index
    %c0_47 = arith.constant 0 : index
    %88 = vector.load %arg4[%c2, %c0_46, %c0_47] : memref<4x32x32xbf16, #tpu.memory_space<vmem>>, vector<1x32x32xbf16>
    %89 = vector.shape_cast %88 : vector<1x32x32xbf16> to vector<32x32xbf16>
    %cst_48 = arith.constant dense<0.000000e+00> : vector<64x32xf32>
    %90 = tpu.matmul %87, %89, %cst_48 {dimension_numbers = #tpu.dot_dimension_numbers<[1], [0], [0], [1], [0, 0, 1, 1], [], []>} : vector<64x32xbf16>, vector<32x32xbf16>, vector<64x32xf32> -> vector<64x32xf32>
    %c2_49 = arith.constant 2 : index
    %c0_50 = arith.constant 0 : index
    %c0_51 = arith.constant 0 : index
    %91 = vector.load %arg5[%c2_49, %c0_50, %c0_51] : memref<4x1x32xf32, #tpu.memory_space<vmem>>, vector<1x1x32xf32>
    %92 = vector.shape_cast %91 : vector<1x1x32xf32> to vector<1x32xf32>
    %93 = vector.broadcast %92 : vector<1x32xf32> to vector<64x32xf32>
    %94 = arith.addf %90, %93 : vector<64x32xf32>
    %c0_52 = arith.constant 0 : index
    %c0_53 = arith.constant 0 : index
    %95 = vector.load %arg7[%c0_52, %c0_53] : memref<16x64xbf16, #tpu.memory_space<vmem>>, vector<16x64xbf16>
    %cst_54 = arith.constant dense<0.000000e+00> : vector<16x32xf32>
    %96 = tpu.matmul %95, %87, %cst_54 {dimension_numbers = #tpu.dot_dimension_numbers<[1], [0], [0], [1], [0, 0, 1, 1], [], []>} : vector<16x64xbf16>, vector<64x32xbf16>, vector<16x32xf32> -> vector<16x32xf32>
    %97 = vector.extract_strided_slice %96 {offsets = [0, 0], sizes = [8, 32], strides = [1, 1]} : vector<16x32xf32> to vector<8x32xf32>
    %98 = vector.extract_strided_slice %96 {offsets = [8, 0], sizes = [8, 32], strides = [1, 1]} : vector<16x32xf32> to vector<8x32xf32>
    %99 = tpu.concatenate %97, %98 in 1 : vector<8x32xf32>, vector<8x32xf32> -> vector<8x64xf32>
    %100 = tpu.concatenate %99, %99, %99, %99, %99, %99, %99, %99 in 1 : vector<8x64xf32>, vector<8x64xf32>, vector<8x64xf32>, vector<8x64xf32>, vector<8x64xf32>, vector<8x64xf32>, vector<8x64xf32>, vector<8x64xf32> -> vector<8x512xf32>
    %cst_55 = arith.constant 0.000000e+00 : f32
    %101 = vector.broadcast %cst_55 : f32 to vector<8x512xf32>
    %102 = arith.select %28, %100, %101 : vector<8x512xi1>, vector<8x512xf32>
    %103 = arith.truncf %102 : vector<8x512xf32> to vector<8x512xbf16>
    %c2_56 = arith.constant 2 : index
    %c0_57 = arith.constant 0 : index
    %c0_58 = arith.constant 0 : index
    %104 = vector.load %arg6[%c2_56, %c0_57, %c0_58] : memref<4x512x64xbf16, #tpu.memory_space<vmem>>, vector<1x512x64xbf16>
    %105 = vector.shape_cast %104 : vector<1x512x64xbf16> to vector<512x64xbf16>
    %cst_59 = arith.constant dense<0.000000e+00> : vector<8x64xf32>
    %106 = tpu.matmul %103, %105, %cst_59 {dimension_numbers = #tpu.dot_dimension_numbers<[1], [0], [0], [1], [0, 0, 1, 1], [], []>} : vector<8x512xbf16>, vector<512x64xbf16>, vector<8x64xf32> -> vector<8x64xf32>
    %107 = vector.extract_strided_slice %106 {offsets = [0, 0], sizes = [8, 32], strides = [1, 1]} : vector<8x64xf32> to vector<8x32xf32>
    %108 = vector.extract_strided_slice %106 {offsets = [0, 32], sizes = [8, 32], strides = [1, 1]} : vector<8x64xf32> to vector<8x32xf32>
    %109 = tpu.concatenate %107, %108 in 0 : vector<8x32xf32>, vector<8x32xf32> -> vector<16x32xf32>
    %c0_60 = arith.constant 0 : index
    %c0_61 = arith.constant 0 : index
    %110 = vector.load %arg8[%c0_60, %c0_61] : memref<64x16xbf16, #tpu.memory_space<vmem>>, vector<64x16xbf16>
    %111 = arith.truncf %109 : vector<16x32xf32> to vector<16x32xbf16>
    %cst_62 = arith.constant dense<0.000000e+00> : vector<64x32xf32>
    %112 = tpu.matmul %110, %111, %cst_62 {dimension_numbers = #tpu.dot_dimension_numbers<[1], [0], [0], [1], [0, 0, 1, 1], [], []>} : vector<64x16xbf16>, vector<16x32xbf16>, vector<64x32xf32> -> vector<64x32xf32>
    %113 = arith.addf %94, %112 : vector<64x32xf32>
    %cst_63 = arith.constant 0.000000e+00 : f32
    %114 = vector.broadcast %cst_63 : f32 to vector<64x32xf32>
    %115 = arith.maximumf %113, %114 : vector<64x32xf32>
    %116 = arith.truncf %115 : vector<64x32xf32> to vector<64x32xbf16>
    %c3 = arith.constant 3 : index
    %c0_64 = arith.constant 0 : index
    %c0_65 = arith.constant 0 : index
    %117 = vector.load %arg4[%c3, %c0_64, %c0_65] : memref<4x32x32xbf16, #tpu.memory_space<vmem>>, vector<1x32x32xbf16>
    %118 = vector.shape_cast %117 : vector<1x32x32xbf16> to vector<32x32xbf16>
    %cst_66 = arith.constant dense<0.000000e+00> : vector<64x32xf32>
    %119 = tpu.matmul %116, %118, %cst_66 {dimension_numbers = #tpu.dot_dimension_numbers<[1], [0], [0], [1], [0, 0, 1, 1], [], []>} : vector<64x32xbf16>, vector<32x32xbf16>, vector<64x32xf32> -> vector<64x32xf32>
    %c3_67 = arith.constant 3 : index
    %c0_68 = arith.constant 0 : index
    %c0_69 = arith.constant 0 : index
    %120 = vector.load %arg5[%c3_67, %c0_68, %c0_69] : memref<4x1x32xf32, #tpu.memory_space<vmem>>, vector<1x1x32xf32>
    %121 = vector.shape_cast %120 : vector<1x1x32xf32> to vector<1x32xf32>
    %122 = vector.broadcast %121 : vector<1x32xf32> to vector<64x32xf32>
    %123 = arith.addf %119, %122 : vector<64x32xf32>
    %c0_70 = arith.constant 0 : index
    %c0_71 = arith.constant 0 : index
    %124 = vector.load %arg7[%c0_70, %c0_71] : memref<16x64xbf16, #tpu.memory_space<vmem>>, vector<16x64xbf16>
    %cst_72 = arith.constant dense<0.000000e+00> : vector<16x32xf32>
    %125 = tpu.matmul %124, %116, %cst_72 {dimension_numbers = #tpu.dot_dimension_numbers<[1], [0], [0], [1], [0, 0, 1, 1], [], []>} : vector<16x64xbf16>, vector<64x32xbf16>, vector<16x32xf32> -> vector<16x32xf32>
    %126 = vector.extract_strided_slice %125 {offsets = [0, 0], sizes = [8, 32], strides = [1, 1]} : vector<16x32xf32> to vector<8x32xf32>
    %127 = vector.extract_strided_slice %125 {offsets = [8, 0], sizes = [8, 32], strides = [1, 1]} : vector<16x32xf32> to vector<8x32xf32>
    %128 = tpu.concatenate %126, %127 in 1 : vector<8x32xf32>, vector<8x32xf32> -> vector<8x64xf32>
    %129 = tpu.concatenate %128, %128, %128, %128, %128, %128, %128, %128 in 1 : vector<8x64xf32>, vector<8x64xf32>, vector<8x64xf32>, vector<8x64xf32>, vector<8x64xf32>, vector<8x64xf32>, vector<8x64xf32>, vector<8x64xf32> -> vector<8x512xf32>
    %cst_73 = arith.constant 0.000000e+00 : f32
    %130 = vector.broadcast %cst_73 : f32 to vector<8x512xf32>
    %131 = arith.select %28, %129, %130 : vector<8x512xi1>, vector<8x512xf32>
    %132 = arith.truncf %131 : vector<8x512xf32> to vector<8x512xbf16>
    %c3_74 = arith.constant 3 : index
    %c0_75 = arith.constant 0 : index
    %c0_76 = arith.constant 0 : index
    %133 = vector.load %arg6[%c3_74, %c0_75, %c0_76] : memref<4x512x64xbf16, #tpu.memory_space<vmem>>, vector<1x512x64xbf16>
    %134 = vector.shape_cast %133 : vector<1x512x64xbf16> to vector<512x64xbf16>
    %cst_77 = arith.constant dense<0.000000e+00> : vector<8x64xf32>
    %135 = tpu.matmul %132, %134, %cst_77 {dimension_numbers = #tpu.dot_dimension_numbers<[1], [0], [0], [1], [0, 0, 1, 1], [], []>} : vector<8x512xbf16>, vector<512x64xbf16>, vector<8x64xf32> -> vector<8x64xf32>
    %136 = vector.extract_strided_slice %135 {offsets = [0, 0], sizes = [8, 32], strides = [1, 1]} : vector<8x64xf32> to vector<8x32xf32>
    %137 = vector.extract_strided_slice %135 {offsets = [0, 32], sizes = [8, 32], strides = [1, 1]} : vector<8x64xf32> to vector<8x32xf32>
    %138 = tpu.concatenate %136, %137 in 0 : vector<8x32xf32>, vector<8x32xf32> -> vector<16x32xf32>
    %c0_78 = arith.constant 0 : index
    %c0_79 = arith.constant 0 : index
    %139 = vector.load %arg8[%c0_78, %c0_79] : memref<64x16xbf16, #tpu.memory_space<vmem>>, vector<64x16xbf16>
    %140 = arith.truncf %138 : vector<16x32xf32> to vector<16x32xbf16>
    %cst_80 = arith.constant dense<0.000000e+00> : vector<64x32xf32>
    %141 = tpu.matmul %139, %140, %cst_80 {dimension_numbers = #tpu.dot_dimension_numbers<[1], [0], [0], [1], [0, 0, 1, 1], [], []>} : vector<64x16xbf16>, vector<16x32xbf16>, vector<64x32xf32> -> vector<64x32xf32>
    %142 = arith.addf %123, %141 : vector<64x32xf32>
    %cst_81 = arith.constant 0.000000e+00 : f32
    %143 = vector.broadcast %cst_81 : f32 to vector<64x32xf32>
    %144 = arith.maximumf %142, %143 : vector<64x32xf32>
    %145 = arith.truncf %144 : vector<64x32xf32> to vector<64x32xbf16>
    %c0_82 = arith.constant 0 : index
    %c0_83 = arith.constant 0 : index
    %146 = vector.load %arg9[%c0_82, %c0_83] : memref<32x1xbf16, #tpu.memory_space<vmem>>, vector<32x1xbf16>
    %cst_84 = arith.constant dense<0.000000e+00> : vector<64x1xf32>
    %147 = tpu.matmul %145, %146, %cst_84 {dimension_numbers = #tpu.dot_dimension_numbers<[1], [0], [0], [1], [0, 0, 1, 1], [], []>} : vector<64x32xbf16>, vector<32x1xbf16>, vector<64x1xf32> -> vector<64x1xf32>
    %c0_85 = arith.constant 0 : index
    %c0_86 = arith.constant 0 : index
    %148 = vector.load %arg10[%c0_85, %c0_86] : memref<1x1xf32, #tpu.memory_space<vmem>>, vector<1x1xf32>
    %149 = vector.broadcast %148 : vector<1x1xf32> to vector<64x1xf32>
    %150 = arith.addf %147, %149 : vector<64x1xf32>
    %c0_87 = arith.constant 0 : index
    %c0_88 = arith.constant 0 : index
    %c0_89 = arith.constant 0 : index
    %151 = vector.load %arg11[%c0_87, %c0_88, %c0_89] : memref<1x64x1xf32, #tpu.memory_space<vmem>>, vector<1x64x1xf32>
    %152 = vector.shape_cast %151 : vector<1x64x1xf32> to vector<64x1xf32>
    %153 = vector.shape_cast %150 : vector<64x1xf32> to vector<1x64x1xf32>
    tpu.vector_store %arg11[%c0_87, %c0_88, %c0_89], %153 {strides = array<i32>} : memref<1x64x1xf32, #tpu.memory_space<vmem>>, vector<1x64x1xf32>,
    return
  }
  func.func @transform_0(%arg0: i32) -> (i32, i32, i32) {
    %c0_i32 = arith.constant 0 : i32
    %c0_i32_0 = arith.constant 0 : i32
    %c0_i32_1 = arith.constant 0 : i32
    return %arg0, %c0_i32, %c0_i32_0 : i32, i32, i32
  }
  func.func @transform_1(%arg0: i32) -> (i32, i32) {
    %c0_i32 = arith.constant 0 : i32
    %c0_i32_0 = arith.constant 0 : i32
    %c0_i32_1 = arith.constant 0 : i32
    return %c0_i32, %c0_i32_0 : i32, i32
  }
  func.func @transform_2(%arg0: i32) -> (i32, i32) {
    %c0_i32 = arith.constant 0 : i32
    %c0_i32_0 = arith.constant 0 : i32
    %c0_i32_1 = arith.constant 0 : i32
    return %c0_i32, %c0_i32_0 : i32, i32
  }
  func.func @transform_3(%arg0: i32) -> (i32, i32, i32) {
    %c0_i32 = arith.constant 0 : i32
    %c0_i32_0 = arith.constant 0 : i32
    %c0_i32_1 = arith.constant 0 : i32
    %c0_i32_2 = arith.constant 0 : i32
    return %c0_i32, %c0_i32_0, %c0_i32_1 : i32, i32, i32
  }
  func.func @transform_4(%arg0: i32) -> (i32, i32, i32) {
    %c0_i32 = arith.constant 0 : i32
    %c0_i32_0 = arith.constant 0 : i32
    %c0_i32_1 = arith.constant 0 : i32
    %c0_i32_2 = arith.constant 0 : i32
    return %c0_i32, %c0_i32_0, %c0_i32_1 : i32, i32, i32
  }
  func.func @transform_5(%arg0: i32) -> (i32, i32, i32) {
    %c0_i32 = arith.constant 0 : i32
    %c0_i32_0 = arith.constant 0 : i32
    %c0_i32_1 = arith.constant 0 : i32
    %c0_i32_2 = arith.constant 0 : i32
    return %c0_i32, %c0_i32_0, %c0_i32_1 : i32, i32, i32
  }
  func.func @transform_6(%arg0: i32) -> (i32, i32) {
    %c0_i32 = arith.constant 0 : i32
    %c0_i32_0 = arith.constant 0 : i32
    %c0_i32_1 = arith.constant 0 : i32
    return %c0_i32, %c0_i32_0 : i32, i32
  }
  func.func @transform_7(%arg0: i32) -> (i32, i32) {
    %c0_i32 = arith.constant 0 : i32
    %c0_i32_0 = arith.constant 0 : i32
    %c0_i32_1 = arith.constant 0 : i32
    return %c0_i32, %c0_i32_0 : i32, i32
  }
  func.func @transform_8(%arg0: i32) -> (i32, i32) {
    %c0_i32 = arith.constant 0 : i32
    %c0_i32_0 = arith.constant 0 : i32
    %c0_i32_1 = arith.constant 0 : i32
    return %c0_i32, %c0_i32_0 : i32, i32
  }
  func.func @transform_9(%arg0: i32) -> (i32, i32) {
    %c0_i32 = arith.constant 0 : i32
    %c0_i32_0 = arith.constant 0 : i32
    %c0_i32_1 = arith.constant 0 : i32
    return %c0_i32, %c0_i32_0 : i32, i32
  }
  func.func @transform_10(%arg0: i32) -> (i32, i32, i32) {
    %c0_i32 = arith.constant 0 : i32
    %c0_i32_0 = arith.constant 0 : i32
    %c0_i32_1 = arith.constant 0 : i32
    return %arg0, %c0_i32, %c0_i32_0 : i32, i32, i32
  }
}

</mosaic_0001>

<bundles_post_ra>
// kernel: tpu_custom_call.1
= control target key start
LH: loop header
LB: loop body
LE: loop exit
PB: predicated region body
PF: predicated region fallthrough
CT: control target
= control target key end

     0   :  { %s3637_s15 = smov 0   ;;  %s4277_s0 = inlined_call_operand.vmem [shape: f32[2,64,1], index: 0, kind: input, shape index: {}]   ;;  %s4278_s1 = inlined_call_operand.vmem [shape: f32[2,32], index: 1, kind: input, shape index: {}]   ;;  %s4279_s2 = inlined_call_operand.vmem [shape: f32[1,32], index: 2, kind: input, shape index: {}]   ;;  %s4280_s3 = inlined_call_operand.vmem [shape: bf16[4,32,32], index: 3, kind: input, shape index: {}]   ;;  %s4281_s4 = inlined_call_operand.vmem [shape: f32[4,1,32], index: 4, kind: input, shape index: {}]   ;;  %s4282_s5 = inlined_call_operand.vmem [shape: bf16[4,512,64], index: 5, kind: input, shape index: {}]   ;;  %s4283_s6 = inlined_call_operand.vmem [shape: bf16[16,64], index: 6, kind: input, shape index: {}]   ;;  %s4284_s7 = inlined_call_operand.vmem [shape: bf16[64,16], index: 7, kind: input, shape index: {}]   ;;  %s4285_s8 = inlined_call_operand.vmem [shape: bf16[32,1], index: 8, kind: input, shape index: {}]   ;;  %s4286_s9 = inlined_call_operand.<no memory space> [shape: f32[1,1], index: 9, kind: input, shape index: {}]   ;;  %s4287_s10 = inlined_call_operand.vmem [shape: f32[2,64,1], index: 10, kind: output, shape index: {}]  }
   0x1   :  { %v15_v0 = vstv %s4286_s9 }
   0x2   :  { %16 = vst [vmem:[#allocation2] sm:$0x1] %v15_v0 }
   0x3 LB: > { %s2514_s16 = sadd.s32 4294967295, %s3572_s15   ;;  %p2518_p0 = scmp.ge.s32.totalorder %s3572_s15, 1  ;;  %s3572_s15 = sphi %s3637_s15, %s22_s15  }
   0x4   : > { %p314_p1 = scmp.lt.s32.totalorder %s3572_s15, 3 }
   0x6   : > { %p315_p2 = pnand %p2518_p0, %p314_p1 }
   0x7   : > { %p352_p3 = scmp.lt.s32.totalorder (!%p315_p2), %s2514_s16, 1  ;;  %s3576_s12 = smov (!%p315_p2), 32  }
   0x8   : > { %318 = sbr.rel (%p315_p2) target bundleno = 3515 (0xdbb), region = 60  ;;  %s3577_s29 = smov (!%p315_p2), 64  }
   0x9   : > { %s3578_s30 = smov (!%p315_p2), 96  }
   0xd   : > { %v3574_v1 = vmov 0   ;;  %s4297_s16 = smov (!%p352_p3, %s2514_s16), 1  ;;  %v3575_v10 = vmov 63.0   ;;  %v3395_v11 = vld [vmem:[%s4280_s3 + $0x8] sm:$0xff]  ;;  %v3394_v13 = vld [vmem:[%s4280_s3] sm:$0xff]  ;;  %v371_v15 = vlaneseq  ;;  %vm527_vm1 = vcmask 261120  }
   0xe   : > { %3554 = vset.pattern.permute.xlu1 %v3574_v1  ;;  %3553 = vset.pattern.permute.xlu0 %v3574_v1  ;;  %s3392_s9 = sshll.u32 %s4297_s16, 6  ;;  %3564 = vrcp.f32 %v3575_v10  ;;  %v3556_v35 = vld [vmem:[%s4278_s1] ss:$0 sm:$0xff]  ;;  %v3557_v36 = vld [vmem:[%s4278_s1 + $0x1] ss:$0 sm:$0xff]  ;;  %vm576_vm2 = vcmask 523264  }
   0xf   : > { %3555 = vset.pattern.permute.xlu2 %v3574_v1  ;;  %s356_s19 = scalar_lea.vmem %s4277_s0, %s3392_s9  ;;  %3537 = vmatpush.bf16.msra.mxu3 %v3395_v11  ;;  %v3660_v17 = vshrl.u32 %v371_v15, 7  ;;  %v3558_v57 = vld [vmem:[%s4279_s2] ss:$0 sm:$0xff]  ;;  %s361_s24 = scalar_lea.vmem %s4287_s10, %s3392_s9 }
  0x10   : > { %v369_v2 = vld [vmem:[%s356_s19 + $0x30] sm:$0xff]  ;;  %v367_v3 = vld [vmem:[%s356_s19 + $0x20] sm:$0xff]  ;;  %v370_v5 = vld [vmem:[%s356_s19 + $0x38] sm:$0xff]  ;;  %546 = vmatpush.bf16.msra.mxu0 %v3395_v11 }
  0x11   : > { %436 = vperm.xlu0 %3553, %v369_v2   ;;  %426 = vperm.xlu1 %3554, %v367_v3   ;;  %v365_v4 = vld [vmem:[%s356_s19 + $0x10] sm:$0xff]  ;;  %v368_v6 = vld [vmem:[%s356_s19 + $0x28] sm:$0xff]  ;;  %v366_v7 = vld [vmem:[%s356_s19 + $0x18] sm:$0xff]  ;;  %v378_v19 = vadd.s32 48, %v3660_v17  ;;  %v376_v20 = vadd.s32 32, %v3660_v17  ;;  %v379_v22 = vadd.s32 56, %v3660_v17  ;;  %v380_v53 = vcvt.s32.f32 %v3660_v17 }
  0x12   : > { %416 = vperm.xlu2 %3555, %v365_v4   ;;  %v364_v8 = vld [vmem:[%s356_s19 + $0x8] sm:$0xff]  ;;  %v363_v9 = vld [vmem:[%s356_s19] sm:$0xff]  ;;  %v377_v23 = vadd.s32 40, %v3660_v17  ;;  %v374_v28 = vadd.s32 16, %v3660_v17  ;;  %v375_v29 = vadd.s32 24, %v3660_v17  ;;  %v373_v40 = vadd.s32 8, %v3660_v17 }
  0x13   : > { %3538 = vmatpush.bf16.msra.mxu3 %v3394_v13  ;;  %v386_v24 = vcvt.s32.f32 %v378_v19  ;;  %v384_v25 = vcvt.s32.f32 %v376_v20  ;;  %v387_v30 = vcvt.s32.f32 %v379_v22 }
  0x14   : > { %v3565_v12 = vpop.eup %3564  ;;  %547 = vmatpush.bf16.msra.mxu0 %v3394_v13  ;;  %v385_v31 = vcvt.s32.f32 %v377_v23  ;;  %v382_v38 = vcvt.s32.f32 %v374_v28  ;;  %v383_v39 = vcvt.s32.f32 %v375_v29  ;;  %v381_v49 = vcvt.s32.f32 %v373_v40  ;;  %v3684_v29 = vld [vmem:[%s4283_s6] sm:$0xff]  ;;  %v3418_v40 = vld [vmem:[%s4282_s5 + $0xa8] sm:$0xff] }
  0x15   : > { %v389_v14 = vmul.f32 63.0, %v3565_v12  ;;  %vm393_vm0 = vweird.f32 %v3565_v12 }
  0x17   : > { %v390_v16 = vsub.f32 1.0, %v389_v14 }
  0x19   : > { %441 = vperm.xlu0 %3553, %v370_v5   ;;  %431 = vperm.xlu1 %3554, %v368_v6   ;;  %v391_v18 = vmul.f32 %v3565_v12, %v390_v16 }
  0x1a   : > { %421 = vperm.xlu2 %3555, %v366_v7  }
  0x1b   : > { %v392_v21 = vadd.f32 %v3565_v12, %v391_v18 }
  0x1d   : > { %v394_v27 = vsel %vm393_vm0, %v3565_v12, %v392_v21 }
  0x1e   : > { %v401_v34 = vmul.f32 %v394_v27, %v386_v24  ;;  %v399_v37 = vmul.f32 %v394_v27, %v384_v25  ;;  %v402_v41 = vmul.f32 %v394_v27, %v387_v30  ;;  %v400_v42 = vmul.f32 %v394_v27, %v385_v31 }
  0x1f   : > { %v397_v47 = vmul.f32 %v394_v27, %v382_v38  ;;  %v398_v48 = vmul.f32 %v394_v27, %v383_v39  ;;  %v396_v0 = vmul.f32 %v394_v27, %v381_v49  ;;  %v395_v4 = vmul.f32 %v394_v27, %v380_v53  ;;  %v3402_v38 = vld [vmem:[%s4282_s5 + $0x28] sm:$0xff]  ;;  %v3415_v49 = vld [vmem:[%s4282_s5 + $0x90] sm:$0xff]  ;;  %v3397_v53 = vld [vmem:[%s4282_s5] sm:$0xff] }
  0x20   : > { %v461_v43 = vmul.f32 %v3557_v36, %v401_v34  ;;  %v459_v45 = vmul.f32 %v3557_v36, %v399_v37  ;;  %v462_v50 = vmul.f32 %v3557_v36, %v402_v41  ;;  %v460_v51 = vmul.f32 %v3557_v36, %v400_v42  ;;  %v3420_v34 = vld [vmem:[%s4282_s5 + $0xb8] sm:$0xff]  ;;  %v3419_v37 = vld [vmem:[%s4282_s5 + $0xb0] sm:$0xff]  ;;  %v3410_v39 = vld [vmem:[%s4282_s5 + $0x68] sm:$0xff] }
  0x21   : > { %411 = vperm.xlu1 %3554, %v364_v8   ;;  %406 = vperm.xlu0 %3553, %v363_v9   ;;  %v457_v61 = vmul.f32 %v3557_v36, %v397_v47  ;;  %v458_v63 = vmul.f32 %v3557_v36, %v398_v48  ;;  %v456_v10 = vmul.f32 %v3557_v36, %v396_v0  ;;  %v3401_v41 = vld [vmem:[%s4282_s5 + $0x20] sm:$0xff]  ;;  %v3399_v47 = vld [vmem:[%s4282_s5 + $0x10] sm:$0xff]  ;;  %v3422_v0 = vld [vmem:[%s4282_s5 + $0xc8] sm:$0xff] }
  0x22   : > { %v455_v12 = vmul.f32 %v3557_v36, %v395_v4  ;;  %v3411_v36 = vld [vmem:[%s4282_s5 + $0x70] sm:$0xff]  ;;  %v3409_v42 = vld [vmem:[%s4282_s5 + $0x60] sm:$0xff]  ;;  %v488_v4 = vmul.u32 64, %v3660_v17 }
  0x23   : > { %v3407_v48 = vld [vmem:[%s4282_s5 + $0x50] sm:$0xff] }
  0x6c   : > { %v417_v26 = vpop.permute.xlu2 %416 }
  0x6d   : > { %v447_v62 = vmul.f32 %v3556_v35, %v417_v26 }
  0x6f   : > { %v465_v9 = vadd.f32 %v457_v61, %v447_v62  ;;  %v3425_v61 = vld [vmem:[%s4282_s5 + $0xe0] sm:$0xff]  ;;  %v3424_v62 = vld [vmem:[%s4282_s5 + $0xd8] sm:$0xff] }
  0x71   : > { %v477_v23 = vadd.f32 %v3558_v57, %v465_v9 }
  0x74   : > { %v422_v52 = vpop.permute.xlu2 %421 }
  0x75   : > { %v448_v3 = vmul.f32 %v3556_v35, %v422_v52  ;;  %v3414_v52 = vld [vmem:[%s4282_s5 + $0x88] sm:$0xff] }
  0x77   : > { %v466_v11 = vadd.f32 %v458_v63, %v448_v3  ;;  %v3423_v63 = vld [vmem:[%s4282_s5 + $0xd0] sm:$0xff]  ;;  %v484_v3 = vand.u32 127, %v371_v15 }
  0x79   : > { %v478_v24 = vadd.f32 %v3558_v57, %v466_v11  ;;  %vm489_vm3 = vcmp.ge.s32.totalorder %v484_v3, %v488_v4 }
  0x7b   : > { %v504_v28 = vpack.c.bf16 %v478_v24, %v477_v23 }
  0x83   : > { %v437_v32 = vpop.permute.xlu0 %436  ;;  %v427_v33 = vpop.permute.xlu1 %426 }
  0x84   : > { %v451_v44 = vmul.f32 %v3556_v35, %v437_v32  ;;  %v449_v46 = vmul.f32 %v3556_v35, %v427_v33  ;;  %v3404_v32 = vld [vmem:[%s4282_s5 + $0x38] sm:$0xff] }
  0x85   : > { %v3412_v33 = vld [vmem:[%s4282_s5 + $0x78] sm:$0xff]  ;;  %868 = vmatpush.bf16.msra.mxu2 %v3404_v32 }
  0x86   : > { %v469_v56 = vadd.f32 %v461_v43, %v451_v44  ;;  %v467_v58 = vadd.f32 %v459_v45, %v449_v46  ;;  %881 = vmatpush.bf16.msrb.mxu3 %v3412_v33  ;;  %v3417_v43 = vld [vmem:[%s4282_s5 + $0xa0] sm:$0xff]  ;;  %v3400_v44 = vld [vmem:[%s4282_s5 + $0x18] sm:$0xff] }
  0x87   : > { %v3408_v45 = vld [vmem:[%s4282_s5 + $0x58] sm:$0xff] }
  0x88   : > { %v479_v5 = vadd.f32 %v3558_v57, %v467_v58  ;;  %v481_v7 = vadd.f32 %v3558_v57, %v469_v56  ;;  %v3416_v46 = vld [vmem:[%s4282_s5 + $0x98] sm:$0xff]  ;;  %v3426_v58 = vld [vmem:[%s4282_s5 + $0xe8] sm:$0xff] }
  0x8a   : > { %882 = vmatpush.bf16.msrb.mxu3 %v3411_v36  ;;  %v3839_v36 = vld [vmem:[%s4284_s7 + $0x10] sm:$0xff] }
  0x8b   : > { %v442_v54 = vpop.permute.xlu0 %441  ;;  %v432_v55 = vpop.permute.xlu1 %431 }
  0x8c   : > { %v452_v59 = vmul.f32 %v3556_v35, %v442_v54  ;;  %v450_v60 = vmul.f32 %v3556_v35, %v432_v55  ;;  %v3428_v54 = vld [vmem:[%s4282_s5 + $0xf8] sm:$0xff] }
  0x8e   : > { %v470_v1 = vadd.f32 %v462_v50, %v452_v59  ;;  %v468_v2 = vadd.f32 %v460_v51, %v450_v60  ;;  %883 = vmatpush.bf16.msrb.mxu3 %v3410_v39  ;;  %v3398_v50 = vld [vmem:[%s4282_s5 + $0x8] sm:$0xff]  ;;  %v3405_v59 = vld [vmem:[%s4282_s5 + $0x40] sm:$0xff]  ;;  %v3433_v39 = vld [vmem:[%s4280_s3 + $0x10] sm:$0xff] }
  0x8f   : > { %v3406_v51 = vld [vmem:[%s4282_s5 + $0x48] sm:$0xff]  ;;  %v3413_v60 = vld [vmem:[%s4282_s5 + $0x80] sm:$0xff] }
  0x90   : > { %v480_v6 = vadd.f32 %v3558_v57, %v468_v2  ;;  %v482_v8 = vadd.f32 %v3558_v57, %v470_v1  ;;  %v3421_v1 = vld [vmem:[%s4282_s5 + $0xc0] sm:$0xff]  ;;  %v493_v2 = vadd.s32 1, %v3660_v17 }
  0x92   : > { %v505_v13 = vpack.c.bf16 %v480_v6, %v479_v5  ;;  %v506_v14 = vpack.c.bf16 %v482_v8, %v481_v7  ;;  %884 = vmatpush.bf16.msrb.mxu3 %v3409_v42  ;;  %v494_v5 = vmul.u32 64, %v493_v2  ;;  %v485_v6 = vadd.s32 128, %v484_v3 }
  0x93   : > { %v412_v16 = vpop.permute.xlu1 %411  ;;  %v407_v18 = vpop.permute.xlu0 %406  ;;  %v486_v7 = vadd.s32 256, %v484_v3 }
  0x94   : > { %v446_v19 = vmul.f32 %v3556_v35, %v412_v16  ;;  %v445_v20 = vmul.f32 %v3556_v35, %v407_v18  ;;  %2533 = vmatmul.msk.bf16.vlgmr.msra.gmra.mxu3 %vm527_vm1, %v505_v13  ;;  %584 = vmatpush.bf16.msra.mxu1 %v506_v14  ;;  %v3403_v35 = vld [vmem:[%s4282_s5 + $0x30] sm:$0xff]  ;;  %vm495_vm4 = vcmp.lt.s32.totalorder %v484_v3, %v494_v5 }
  0x95   : > { %869 = vmatpush.bf16.msra.mxu2 %v3403_v35  ;;  %vm490_vm5 = vcmp.ge.s32.totalorder %v485_v6, %v488_v4  ;;  %vm496_vm6 = vcmp.lt.s32.totalorder %v485_v6, %v494_v5  ;;  %vm491_vm7 = vcmp.ge.s32.totalorder %v486_v7, %v488_v4  ;;  %vm497_vm8 = vcmp.lt.s32.totalorder %v486_v7, %v494_v5  ;;  %vm499_vm9 = vmand %vm489_vm3, %vm495_vm4  ;;  %v3832_v35 = vld [vmem:[%s4284_s7 + $0x8] sm:$0xff] }
  0x96   : > { %v464_v21 = vadd.f32 %v456_v10, %v446_v19  ;;  %v463_v22 = vadd.f32 %v455_v12, %v445_v20  ;;  %885 = vmatpush.bf16.msrb.mxu3 %v3408_v45  ;;  %vm500_vm10 = vmand %vm490_vm5, %vm496_vm6  ;;  %v487_v12 = vadd.s32 384, %v484_v3  ;;  %vm953_vm5 = vcmask 130048  }
  0x97   : > { %vm501_vm11 = vmand %vm491_vm7, %vm497_vm8 }
  0x98   : > { %v476_v25 = vadd.f32 %v3558_v57, %v464_v21  ;;  %v475_v26 = vadd.f32 %v3558_v57, %v463_v22  ;;  %585 = vmatpush.bf16.msra.mxu1 %v505_v13  ;;  %v3427_v57 = vld [vmem:[%s4282_s5 + $0xf0] sm:$0xff]  ;;  %vm3792_vm12 = vmpackc.low %vm499_vm9, %vm499_vm9  ;;  %vm492_vm15 = vcmp.ge.s32.totalorder %v487_v12, %v488_v4  ;;  %vm498_vm0 = vcmp.lt.s32.totalorder %v487_v12, %v494_v5 }
  0x99   : > { %870 = vmatpush.bf16.msra.mxu2 %v3402_v38  ;;  %vm3797_vm13 = vmpackc.low %vm500_vm10, %vm500_vm10  ;;  %v3434_v38 = vld [vmem:[%s4280_s3 + $0x18] sm:$0xff] }
  0x9a   : > { %v503_v27 = vpack.c.bf16 %v476_v25, %v475_v26  ;;  %886 = vmatpush.bf16.msrb.mxu3 %v3407_v48  ;;  %vm3801_vm14 = vmpackc.low %vm501_vm11, %vm501_vm11 }
  0x9b   : > { %vm502_vm3 = vmand %vm492_vm15, %vm498_vm0 }
  0x9c   : > { %2531 = vmatmul.msk.bf16.vlgmr.msra.gmra.mxu0 %vm527_vm1, %v503_v27  ;;  %586 = vmatpush.bf16.msra.mxu1 %v504_v28  ;;  %vm3811_vm4 = vmpackc.low %vm502_vm3, %vm502_vm3 }
  0x9d   : > { %871 = vmatpush.bf16.msra.mxu2 %v3401_v41 }
  0x9e   : > { %887 = vmatpush.bf16.msrb.mxu3 %v3406_v51 }
  0xa0   : > { %587 = vmatpush.bf16.msra.mxu1 %v503_v27 }
  0xa1   : > { %872 = vmatpush.bf16.msra.mxu2 %v3400_v44 }
  0xa2   : > { %888 = vmatpush.bf16.msrb.mxu3 %v3405_v59 }
  0xa3   : > { %2539 = vmatmul.msk.bf16.vlgmr.msra.gmra.mxu1 %vm576_vm2, %v3684_v29 }
  0xa4   : > { %2534 = vmatmul.msk.bf16.gmra.mxu3 %vm527_vm1, %v506_v14  ;;  %894 = vmatpush.bf16.msrb.mxu1 %v3420_v34  ;;  %v3825_v34 = vld [vmem:[%s4284_s7] sm:$0xff] }
  0xa5   : > { %873 = vmatpush.bf16.msra.mxu2 %v3399_v47 }
  0xa8   : > { %895 = vmatpush.bf16.msrb.mxu1 %v3419_v37  ;;  %v3846_v37 = vld [vmem:[%s4284_s7 + $0x18] sm:$0xff] }
  0xa9   : > { %874 = vmatpush.bf16.msra.mxu2 %v3398_v50 }
  0xac   : > { %2532 = vmatmul.msk.bf16.gmra.mxu0 %vm527_vm1, %v504_v28  ;;  %896 = vmatpush.bf16.msrb.mxu1 %v3418_v40 }
  0xad   : > { %875 = vmatpush.bf16.msra.mxu2 %v3397_v53 }
  0xb0   : > { %897 = vmatpush.bf16.msrb.mxu1 %v3417_v43  ;;  %v3559_v43 = vld [vmem:[%s4281_s4] ss:$0 sm:$0xff] }
  0xb1   : > { %907 = vmatpush.bf16.msrb.mxu2 %v3428_v54 }
  0xb4   : > { %898 = vmatpush.bf16.msrb.mxu1 %v3416_v46 }
  0xb5   : > { %908 = vmatpush.bf16.msrb.mxu2 %v3427_v57 }
  0xb8   : > { %899 = vmatpush.bf16.msrb.mxu1 %v3415_v49 }
  0xb9   : > { %909 = vmatpush.bf16.msrb.mxu2 %v3426_v58 }
  0xbc   : > { %900 = vmatpush.bf16.msrb.mxu1 %v3414_v52 }
  0xbd   : > { %910 = vmatpush.bf16.msrb.mxu2 %v3425_v61 }
  0xc0   : > { %901 = vmatpush.bf16.msrb.mxu1 %v3413_v60 }
  0xc1   : > { %911 = vmatpush.bf16.msrb.mxu2 %v3424_v62 }
  0xc4   : > { %1055 = vmatpush.bf16.msra.mxu1 %v3434_v38  ;;  %v3440_v38 = vld [vmem:[%s4282_s5 + $0x128] sm:$0xff] }
  0xc5   : > { %912 = vmatpush.bf16.msrb.mxu2 %v3423_v63 }
  0xc8   : > { %1056 = vmatpush.bf16.msra.mxu1 %v3433_v39  ;;  %v3448_v39 = vld [vmem:[%s4282_s5 + $0x168] sm:$0xff] }
  0xc9   : > { %913 = vmatpush.bf16.msrb.mxu2 %v3422_v0 }
  0xcd   : > { %914 = vmatpush.bf16.msrb.mxu2 %v3421_v1 }
 0x117   : > { %v559_v14 = vpop.f32.mrf.mxu3 }
 0x118   : > { %v560_v0 = vadd.f32 %v3559_v43, %v559_v14 }
 0x119   : > { %v549_v40 = vpop.f32.mrf.mxu0 }
 0x11a   : > { %v550_v44 = vadd.f32 %v3559_v43, %v549_v40  ;;  %v3455_v40 = vld [vmem:[%s4282_s5 + $0x1a0] sm:$0xff] }
 0x11f   : > { %v561_v16 = vpop.f32.mrf.mxu3 }
 0x120   : > { %v589_v30 = vpop.f32.mrf.mxu1  ;;  %v562_v1 = vadd.f32 %v3559_v43, %v561_v16 }
 0x121   : > { %v551_v41 = vpop.f32.mrf.mxu0 }
 0x122   : > { %v552_v45 = vadd.f32 %v3559_v43, %v551_v41  ;;  %v3463_v41 = vld [vmem:[%s4282_s5 + $0x1e0] sm:$0xff] }
 0x127   : > { %v3817_v18 = vpop.f32.mrf.mxu3 }
 0x128   : > { %v591_v31 = vpop.f32.mrf.mxu1 }
 0x129   : > { %595 = vrot.lane.b32.xlu2 %v591_v31, %s3576_s12  ;;  %v554_v49 = vpop.f32.mrf.mxu0 }
 0x12f   : > { %v3819_v19 = vpop.f32.mrf.mxu3 }
 0x131   : > { %v556_v54 = vpop.f32.mrf.mxu0 }
 0x183   : > { %v596_v55 = vpop.permute.xlu2 %595 }
 0x184   : > { %v598_v56 = vsel %vm527_vm1, %v589_v30, %v596_v55  ;;  %v555_v55 = vadd.f32 %v3559_v43, %v554_v49  ;;  %v3461_v49 = vld [vmem:[%s4282_s5 + $0x1d0] sm:$0xff] }
 0x185   : > { %600 = vrot.lane.b32.xlu0 %v598_v56, %s3577_s29 }
 0x1f7   : > { %v601_v8 = vpop.permute.xlu0 %600 }
 0x1f8   : > { %v603_v15 = vsel %vm576_vm2, %v598_v56, %v601_v8  ;;  %v557_v56 = vadd.f32 %v3559_v43, %v556_v54  ;;  %v3436_v54 = vld [vmem:[%s4282_s5 + $0x108] sm:$0xff] }
 0x1f9   : > { %v2669_v10 = vpack.c.bf16 %v603_v15, %v603_v15  ;;  %v565_v15 = vadd.f32 %v3559_v43, %v3817_v18  ;;  %v3458_v18 = vld [vmem:[%s4282_s5 + $0x1b8] sm:$0xff] }
 0x1fb   : > { %2670 = vmatmul.msk.bf16.vlgmr.msra.gmra.mxu2 %vm3792_vm12, %v2669_v10  ;;  %2673 = vmatmul.msk.bf16.vlgmr.msrb.gmra.mxu3 %vm3797_vm13, %v2669_v10 }
 0x1fc   : > { %2676 = vmatmul.msk.bf16.vlgmr.msrb.gmra.mxu1 %vm3801_vm14, %v2669_v10 }
 0x20b   : > { %2679 = vmatmul.msk.bf16.vlgmr.msrb.gmra.mxu2 %vm3811_vm4, %v2669_v10  ;;  %v567_v10 = vadd.f32 %v3559_v43, %v3819_v19  ;;  %v3466_v19 = vld [vmem:[%s4282_s5 + $0x1f8] sm:$0xff]  ;;  %v3447_v43 = vld [vmem:[%s4282_s5 + $0x160] sm:$0xff] }
 0x20c   : > { %1406 = vmatpush.bf16.msrb.mxu1 %v3466_v19 }
 0x279   : > { %v903_v20 = vpop.f32.mrf.mxu1 }
 0x27e   : > { %v877_v21 = vpop.f32.mrf.mxu2  ;;  %v890_v22 = vpop.f32.mrf.mxu3 }
 0x27f   : > { %v891_v26 = vadd.f32 %v890_v22, %v877_v21 }
 0x281   : > { %v905_v23 = vpop.f32.mrf.mxu1  ;;  %v904_v27 = vadd.f32 %v903_v20, %v891_v26  ;;  %v3450_v26 = vld [vmem:[%s4282_s5 + $0x178] sm:$0xff] }
 0x286   : > { %v879_v24 = vpop.f32.mrf.mxu2  ;;  %v892_v25 = vpop.f32.mrf.mxu3 }
 0x287   : > { %v3442_v25 = vld [vmem:[%s4282_s5 + $0x138] sm:$0xff] }
 0x288   : > { %1367 = vmatpush.bf16.msra.mxu2 %v3442_v25 }
 0x28e   : > { %v916_v28 = vpop.f32.mrf.mxu2 }
 0x28f   : > { %v917_v30 = vadd.f32 %v916_v28, %v904_v27  ;;  %v3457_v27 = vld [vmem:[%s4282_s5 + $0x1b0] sm:$0xff] }
 0x290   : > { %v3465_v28 = vld [vmem:[%s4282_s5 + $0x1f0] sm:$0xff] }
 0x291   : > { %921 = vrot.lane.b32.xlu1 %v917_v30, %s3578_s30  ;;  %1407 = vmatpush.bf16.msrb.mxu1 %v3465_v28 }
 0x296   : > { %v918_v31 = vpop.f32.mrf.mxu2 }
 0x297   : > { %v3449_v31 = vld [vmem:[%s4282_s5 + $0x170] sm:$0xff] }
 0x303   : > { %v922_v32 = vpop.permute.xlu1 %921 }
 0x304   : > { %v932_v33 = vpack.c.bf16 %v922_v32, %v917_v30  ;;  %v3441_v30 = vld [vmem:[%s4282_s5 + $0x130] sm:$0xff]  ;;  %v3456_v32 = vld [vmem:[%s4282_s5 + $0x1a8] sm:$0xff] }
 0x305   : > { %1368 = vmatpush.bf16.msra.mxu2 %v3441_v30  ;;  %v3560_v30 = vld [vmem:[%s4281_s4 + $0x1] ss:$0 sm:$0xff] }
 0x306   : > { %973 = vmatpush.bf16.msra.mxu3 %v932_v33  ;;  %v3464_v33 = vld [vmem:[%s4282_s5 + $0x1e8] sm:$0xff] }
 0x307   : > { %1408 = vmatpush.bf16.msrb.mxu1 %v3464_v33 }
 0x309   : > { %2696 = vmatmul.msk.bf16.vlgmr.msra.gmra.mxu3 %vm953_vm5, %v3825_v34  ;;  %1369 = vmatpush.bf16.msra.mxu2 %v3440_v38 }
 0x30a   : > { %1393 = vmatpush.bf16.msrb.mxu3 %v3458_v18 }
 0x30b   : > { %1409 = vmatpush.bf16.msrb.mxu1 %v3463_v41 }
 0x30e   : > { %1394 = vmatpush.bf16.msrb.mxu3 %v3457_v27  ;;  %v3467_v27 = vld [vmem:[%s4280_s3 + $0x20] sm:$0xff] }
 0x312   : > { %1395 = vmatpush.bf16.msrb.mxu3 %v3456_v32 }
 0x316   : > { %1396 = vmatpush.bf16.msrb.mxu3 %v3455_v40 }
 0x319   : > { %2697 = vmatmul.msk.bf16.gmra.mxu3 %vm953_vm5, %v3832_v35 }
 0x329   : > { %2698 = vmatmul.msk.bf16.gmra.mxu3 %vm953_vm5, %v3839_v36 }
 0x339   : > { %2699 = vmatmul.msk.bf16.gmra.mxu3 %vm953_vm5, %v3846_v37 }
 0x38c   : > { %v975_v42 = vpop.f32.mrf.mxu3 }
 0x38d   : > { %v995_v46 = vadd.f32 %v975_v42, %v550_v44  ;;  %v3439_v42 = vld [vmem:[%s4282_s5 + $0x120] sm:$0xff]  ;;  %v3454_v44 = vld [vmem:[%s4282_s5 + $0x198] sm:$0xff] }
 0x38e   : > { %1370 = vmatpush.bf16.msra.mxu2 %v3439_v42  ;;  %1397 = vmatpush.bf16.msrb.mxu3 %v3454_v44 }
 0x38f   : > { %v1003_v50 = vmax.f32 %v995_v46, 0.0  ;;  %v3438_v46 = vld [vmem:[%s4282_s5 + $0x118] sm:$0xff] }
 0x392   : > { %1371 = vmatpush.bf16.msra.mxu2 %v3438_v46 }
 0x394   : > { %v977_v47 = vpop.f32.mrf.mxu3 }
 0x395   : > { %v996_v48 = vadd.f32 %v977_v47, %v552_v45  ;;  %v3462_v45 = vld [vmem:[%s4282_s5 + $0x1d8] sm:$0xff] }
 0x396   : > { %v3446_v47 = vld [vmem:[%s4282_s5 + $0x158] sm:$0xff]  ;;  %1410 = vmatpush.bf16.msrb.mxu1 %v3462_v45 }
 0x397   : > { %v1004_v51 = vmax.f32 %v996_v48, 0.0  ;;  %v3453_v48 = vld [vmem:[%s4282_s5 + $0x190] sm:$0xff] }
 0x398   : > { %1398 = vmatpush.bf16.msrb.mxu3 %v3453_v48 }
 0x399   : > { %v1011_v52 = vpack.c.bf16 %v1004_v51, %v1003_v50  ;;  %v3437_v50 = vld [vmem:[%s4282_s5 + $0x110] sm:$0xff] }
 0x39a   : > { %v3445_v51 = vld [vmem:[%s4282_s5 + $0x150] sm:$0xff]  ;;  %1411 = vmatpush.bf16.msrb.mxu1 %v3461_v49  ;;  %1372 = vmatpush.bf16.msra.mxu2 %v3437_v50 }
 0x39b   : > { %2713 = vmatmul.msk.bf16.vlgmr.msra.gmra.mxu1 %vm527_vm1, %v1011_v52 }
 0x39c   : > { %v980_v53 = vpop.f32.mrf.mxu3 }
 0x39d   : > { %v997_v57 = vadd.f32 %v980_v53, %v555_v55  ;;  %v3460_v53 = vld [vmem:[%s4282_s5 + $0x1c8] sm:$0xff] }
 0x39e   : > { %v3444_v55 = vld [vmem:[%s4282_s5 + $0x148] sm:$0xff]  ;;  %1412 = vmatpush.bf16.msrb.mxu1 %v3460_v53  ;;  %1373 = vmatpush.bf16.msra.mxu2 %v3436_v54 }
 0x39f   : > { %v1005_v60 = vmax.f32 %v997_v57, 0.0 }
 0x3a4   : > { %v982_v58 = vpop.f32.mrf.mxu3 }
 0x3a5   : > { %v998_v59 = vadd.f32 %v982_v58, %v557_v56  ;;  %v3435_v58 = vld [vmem:[%s4282_s5 + $0x100] sm:$0xff] }
 0x3a6   : > { %1374 = vmatpush.bf16.msra.mxu2 %v3435_v58 }
 0x3a7   : > { %v1006_v61 = vmax.f32 %v998_v59, 0.0  ;;  %v3443_v59 = vld [vmem:[%s4282_s5 + $0x140] sm:$0xff] }
 0x3a9   : > { %v1012_v62 = vpack.c.bf16 %v1006_v61, %v1005_v60  ;;  %v3451_v60 = vld [vmem:[%s4282_s5 + $0x180] sm:$0xff] }
 0x3aa   : > { %v3459_v61 = vld [vmem:[%s4282_s5 + $0x1c0] sm:$0xff] }
 0x3ab   : > { %2714 = vmatmul.msk.bf16.gmra.mxu1 %vm527_vm1, %v1012_v62 }
 0x3ac   : > { %v985_v63 = vpop.f32.mrf.mxu3  ;;  %1413 = vmatpush.bf16.msrb.mxu1 %v3459_v61 }
 0x3ad   : > { %v999_v2 = vadd.f32 %v985_v63, %v560_v0 }
 0x3af   : > { %v1007_v5 = vmax.f32 %v999_v2, 0.0 }
 0x3b4   : > { %v987_v3 = vpop.f32.mrf.mxu3 }
 0x3b5   : > { %v1000_v4 = vadd.f32 %v987_v3, %v562_v1 }
 0x3b7   : > { %v1008_v6 = vmax.f32 %v1000_v4, 0.0 }
 0x3b9   : > { %v1013_v7 = vpack.c.bf16 %v1008_v6, %v1007_v5 }
 0x3bb   : > { %2715 = vmatmul.msk.bf16.gmra.mxu1 %vm527_vm1, %v1013_v7 }
 0x3bc   : > { %v990_v8 = vpop.f32.mrf.mxu3 }
 0x3bd   : > { %v1001_v12 = vadd.f32 %v990_v8, %v565_v15 }
 0x3bf   : > { %v1009_v22 = vmax.f32 %v1001_v12, 0.0 }
 0x3c4   : > { %v992_v20 = vpop.f32.mrf.mxu3 }
 0x3c5   : > { %v1002_v21 = vadd.f32 %v992_v20, %v567_v10 }
 0x3c7   : > { %v1010_v23 = vmax.f32 %v1002_v21, 0.0 }
 0x3c9   : > { %v1014_v14 = vpack.c.bf16 %v1010_v23, %v1009_v22 }
 0x3cb   : > { %2716 = vmatmul.msk.bf16.gmra.mxu1 %vm527_vm1, %v1014_v14  ;;  %1082 = vmatpush.bf16.msrb.mxu0 %v1014_v14 }
 0x3cf   : > { %1083 = vmatpush.bf16.msrb.mxu0 %v1013_v7 }
 0x3d3   : > { %1084 = vmatpush.bf16.msrb.mxu0 %v1012_v62 }
 0x3d7   : > { %1085 = vmatpush.bf16.msrb.mxu0 %v1011_v52  ;;  %v3452_v52 = vld [vmem:[%s4282_s5 + $0x188] sm:$0xff] }
 0x3d8   : > { %1399 = vmatpush.bf16.msrb.mxu3 %v3452_v52 }
 0x3da   : > { %2717 = vmatmul.msk.bf16.vlgmr.msrb.gmra.mxu0 %vm576_vm2, %v3684_v29 }
 0x3db   : > { %1380 = vmatpush.bf16.msra.mxu0 %v3450_v26  ;;  %v3468_v26 = vld [vmem:[%s4280_s3 + $0x28] sm:$0xff] }
 0x3dc   : > { %1400 = vmatpush.bf16.msrb.mxu3 %v3451_v60 }
 0x3df   : > { %1381 = vmatpush.bf16.msra.mxu0 %v3449_v31 }
 0x3e3   : > { %1382 = vmatpush.bf16.msra.mxu0 %v3448_v39 }
 0x3e7   : > { %1383 = vmatpush.bf16.msra.mxu0 %v3447_v43 }
 0x3eb   : > { %1384 = vmatpush.bf16.msra.mxu0 %v3446_v47 }
 0x3ef   : > { %1385 = vmatpush.bf16.msra.mxu0 %v3445_v51 }
 0x3f3   : > { %1386 = vmatpush.bf16.msra.mxu0 %v3444_v55 }
 0x3f7   : > { %1387 = vmatpush.bf16.msra.mxu0 %v3443_v59 }
 0x3fb   : > { %1513 = vmatpush.bf16.msrb.mxu0 %v3468_v26  ;;  %v3481_v26 = vld [vmem:[%s4282_s5 + $0x260] sm:$0xff] }
 0x3ff   : > { %1514 = vmatpush.bf16.msrb.mxu0 %v3467_v27  ;;  %v3489_v27 = vld [vmem:[%s4282_s5 + $0x2a0] sm:$0xff] }
 0x418   : > { %v1058_v1 = vpop.f32.mrf.mxu1 }
 0x419   : > { %v1059_v31 = vadd.f32 %v3560_v30, %v1058_v1 }
 0x420   : > { %v1060_v2 = vpop.f32.mrf.mxu1 }
 0x421   : > { %v1061_v33 = vadd.f32 %v3560_v30, %v1060_v2 }
 0x428   : > { %v1063_v3 = vpop.f32.mrf.mxu1 }
 0x429   : > { %v1064_v53 = vadd.f32 %v3560_v30, %v1063_v3 }
 0x430   : > { %v1065_v4 = vpop.f32.mrf.mxu1 }
 0x431   : > { %v1066_v55 = vadd.f32 %v3560_v30, %v1065_v4 }
 0x438   : > { %v1068_v5 = vpop.f32.mrf.mxu1 }
 0x439   : > { %v1069_v41 = vadd.f32 %v3560_v30, %v1068_v5 }
 0x440   : > { %v1070_v6 = vpop.f32.mrf.mxu1 }
 0x441   : > { %v1071_v44 = vadd.f32 %v3560_v30, %v1070_v6 }
 0x448   : > { %v1073_v7 = vpop.f32.mrf.mxu1 }
 0x449   : > { %v1074_v59 = vadd.f32 %v3560_v30, %v1073_v7  ;;  %v3500_v7 = vld [vmem:[%s4282_s5 + $0x2f8] sm:$0xff] }
 0x450   : > { %v1075_v8 = vpop.f32.mrf.mxu1 }
 0x457   : > { %v1087_v16 = vpop.f32.mrf.mxu0 }
 0x45f   : > { %v1089_v24 = vpop.f32.mrf.mxu0 }
 0x460   : > { %1093 = vrot.lane.b32.xlu2 %v1089_v24, %s3576_s12 }
 0x4ba   : > { %v1094_v56 = vpop.permute.xlu2 %1093 }
 0x4bb   : > { %v1096_v57 = vsel %vm527_vm1, %v1087_v16, %v1094_v56 }
 0x4bc   : > { %1098 = vrot.lane.b32.xlu0 %v1096_v57, %s3577_s29 }
 0x52e   : > { %v1099_v62 = vpop.permute.xlu0 %1098 }
 0x52f   : > { %v1101_v63 = vsel %vm576_vm2, %v1096_v57, %v1099_v62  ;;  %v1076_v62 = vadd.f32 %v3560_v30, %v1075_v8  ;;  %v3476_v8 = vld [vmem:[%s4282_s5 + $0x238] sm:$0xff] }
 0x530   : > { %v2911_v0 = vpack.c.bf16 %v1101_v63, %v1101_v63  ;;  %v3496_v30 = vld [vmem:[%s4282_s5 + $0x2d8] sm:$0xff] }
 0x532   : > { %2912 = vmatmul.msk.bf16.vlgmr.msra.gmra.mxu2 %vm3792_vm12, %v2911_v0  ;;  %2915 = vmatmul.msk.bf16.vlgmr.msra.gmra.mxu0 %vm3797_vm13, %v2911_v0 }
 0x533   : > { %2918 = vmatmul.msk.bf16.vlgmr.msrb.gmra.mxu3 %vm3801_vm14, %v2911_v0  ;;  %2921 = vmatmul.msk.bf16.vlgmr.msrb.gmra.mxu1 %vm3811_vm4, %v2911_v0 }
 0x534   : > { %1864 = vmatpush.bf16.msra.mxu0 %v3500_v7 }
 0x5af   : > { %v1389_v15 = vpop.f32.mrf.mxu0 }
 0x5b0   : > { %v1415_v10 = vpop.f32.mrf.mxu1 }
 0x5b5   : > { %v1376_v12 = vpop.f32.mrf.mxu2 }
 0x5b6   : > { %v1390_v20 = vadd.f32 %v1389_v15, %v1376_v12  ;;  %v1402_v21 = vpop.f32.mrf.mxu3  ;;  %v3492_v12 = vld [vmem:[%s4282_s5 + $0x2b8] sm:$0xff] }
 0x5b7   : > { %v1391_v22 = vpop.f32.mrf.mxu0 }
 0x5b8   : > { %v1403_v23 = vadd.f32 %v1402_v21, %v1390_v20  ;;  %v1417_v14 = vpop.f32.mrf.mxu1  ;;  %v3499_v20 = vld [vmem:[%s4282_s5 + $0x2f0] sm:$0xff] }
 0x5b9   : > { %v3475_v21 = vld [vmem:[%s4282_s5 + $0x230] sm:$0xff]  ;;  %1865 = vmatpush.bf16.msra.mxu0 %v3499_v20  ;;  %v3474_v14 = vld [vmem:[%s4282_s5 + $0x228] sm:$0xff] }
 0x5ba   : > { %v1416_v16 = vadd.f32 %v1415_v10, %v1403_v23  ;;  %v3484_v10 = vld [vmem:[%s4282_s5 + $0x278] sm:$0xff]  ;;  %v3483_v22 = vld [vmem:[%s4282_s5 + $0x270] sm:$0xff] }
 0x5bb   : > { %v3491_v23 = vld [vmem:[%s4282_s5 + $0x2b0] sm:$0xff] }
 0x5bc   : > { %1420 = vrot.lane.b32.xlu1 %v1416_v16, %s3578_s30  ;;  %v3501_v20 = vld [vmem:[%s4280_s3 + $0x30] sm:$0xff] }
 0x5bd   : > { %v1378_v24 = vpop.f32.mrf.mxu2 }
 0x5be   : > { %v1404_v18 = vpop.f32.mrf.mxu3  ;;  %v3482_v24 = vld [vmem:[%s4282_s5 + $0x268] sm:$0xff] }
 0x5bf   : > { %v3490_v18 = vld [vmem:[%s4282_s5 + $0x2a8] sm:$0xff] }
 0x62e   : > { %v1421_v19 = vpop.permute.xlu1 %1420 }
 0x62f   : > { %v1423_v25 = vpack.c.bf16 %v1421_v19, %v1416_v16  ;;  %v3498_v16 = vld [vmem:[%s4282_s5 + $0x2e8] sm:$0xff]  ;;  %v3473_v19 = vld [vmem:[%s4282_s5 + $0x220] sm:$0xff] }
 0x630   : > { %1866 = vmatpush.bf16.msra.mxu0 %v3498_v16 }
 0x631   : > { %1431 = vmatpush.bf16.msra.mxu1 %v1423_v25  ;;  %3539 = vmatpush.bf16.msrb.mxu2 %v1423_v25  ;;  %v3497_v25 = vld [vmem:[%s4282_s5 + $0x2e0] sm:$0xff] }
 0x634   : > { %2922 = vmatmul.msk.bf16.vlgmr.msra.gmra.mxu1 %vm953_vm5, %v3825_v34  ;;  %2924 = vmatmul.msk.bf16.vlgmr.msrb.gmra.mxu2 %vm953_vm5, %v3839_v36 }
 0x635   : > { %1825 = vmatpush.bf16.msrb.mxu1 %v3476_v8  ;;  %1851 = vmatpush.bf16.msra.mxu2 %v3492_v12  ;;  %v3502_v12 = vld [vmem:[%s4280_s3 + $0x38] sm:$0xff] }
 0x636   : > { %1867 = vmatpush.bf16.msra.mxu0 %v3497_v25 }
 0x639   : > { %1826 = vmatpush.bf16.msrb.mxu1 %v3475_v21  ;;  %1852 = vmatpush.bf16.msra.mxu2 %v3491_v23 }
 0x63a   : > { %1868 = vmatpush.bf16.msra.mxu0 %v3496_v30 }
 0x63d   : > { %1827 = vmatpush.bf16.msrb.mxu1 %v3474_v14  ;;  %1853 = vmatpush.bf16.msra.mxu2 %v3490_v18 }
 0x641   : > { %1828 = vmatpush.bf16.msrb.mxu1 %v3473_v19  ;;  %1854 = vmatpush.bf16.msra.mxu2 %v3489_v27 }
 0x644   : > { %2923 = vmatmul.msk.bf16.gmra.mxu1 %vm953_vm5, %v3832_v35  ;;  %2925 = vmatmul.msk.bf16.gmra.mxu2 %vm953_vm5, %v3846_v37 }
 0x6b1   : > { %v1433_v28 = vpop.f32.mrf.mxu1 }
 0x6b2   : > { %v1453_v38 = vadd.f32 %v1433_v28, %v1059_v31  ;;  %v3472_v28 = vld [vmem:[%s4282_s5 + $0x218] sm:$0xff] }
 0x6b3   : > { %v3480_v31 = vld [vmem:[%s4282_s5 + $0x258] sm:$0xff]  ;;  %1829 = vmatpush.bf16.msrb.mxu1 %v3472_v28 }
 0x6b4   : > { %v1461_v42 = vmax.f32 %v1453_v38, 0.0  ;;  %v3495_v38 = vld [vmem:[%s4282_s5 + $0x2d0] sm:$0xff] }
 0x6b5   : > { %1869 = vmatpush.bf16.msra.mxu0 %v3495_v38 }
 0x6b7   : > { %v1443_v32 = vpop.f32.mrf.mxu2 }
 0x6b8   : > { %v1457_v45 = vadd.f32 %v1443_v32, %v1069_v41  ;;  %v3488_v32 = vld [vmem:[%s4282_s5 + $0x298] sm:$0xff]  ;;  %v3470_v41 = vld [vmem:[%s4282_s5 + $0x208] sm:$0xff] }
 0x6b9   : > { %v1435_v39 = vpop.f32.mrf.mxu1  ;;  %1855 = vmatpush.bf16.msra.mxu2 %v3488_v32 }
 0x6ba   : > { %v1454_v40 = vadd.f32 %v1435_v39, %v1061_v33  ;;  %v1465_v50 = vmax.f32 %v1457_v45, 0.0  ;;  %v3471_v33 = vld [vmem:[%s4282_s5 + $0x210] sm:$0xff] }
 0x6bb   : > { %v3479_v39 = vld [vmem:[%s4282_s5 + $0x250] sm:$0xff]  ;;  %1830 = vmatpush.bf16.msrb.mxu1 %v3471_v33 }
 0x6bc   : > { %v1462_v43 = vmax.f32 %v1454_v40, 0.0  ;;  %v3487_v40 = vld [vmem:[%s4282_s5 + $0x290] sm:$0xff] }
 0x6bd   : > { %1856 = vmatpush.bf16.msra.mxu2 %v3487_v40 }
 0x6be   : > { %v1469_v46 = vpack.c.bf16 %v1462_v43, %v1461_v42  ;;  %v3494_v42 = vld [vmem:[%s4282_s5 + $0x2c8] sm:$0xff] }
 0x6bf   : > { %v1445_v47 = vpop.f32.mrf.mxu2  ;;  %v3478_v43 = vld [vmem:[%s4282_s5 + $0x248] sm:$0xff]  ;;  %1831 = vmatpush.bf16.msrb.mxu1 %v3470_v41  ;;  %1870 = vmatpush.bf16.msra.mxu0 %v3494_v42 }
 0x6c0   : > { %v1458_v48 = vadd.f32 %v1445_v47, %v1071_v44  ;;  %2939 = vmatmul.msk.bf16.vlgmr.msrb.gmra.mxu0 %vm527_vm1, %v1469_v46  ;;  %v3486_v44 = vld [vmem:[%s4282_s5 + $0x288] sm:$0xff]  ;;  %v3469_v47 = vld [vmem:[%s4282_s5 + $0x200] sm:$0xff] }
 0x6c1   : > { %v1438_v49 = vpop.f32.mrf.mxu1  ;;  %1857 = vmatpush.bf16.msra.mxu2 %v3486_v44 }
 0x6c2   : > { %v1466_v51 = vmax.f32 %v1458_v48, 0.0  ;;  %v1455_v56 = vadd.f32 %v1438_v49, %v1064_v53  ;;  %v3477_v48 = vld [vmem:[%s4282_s5 + $0x240] sm:$0xff] }
 0x6c3   : > { %v3485_v49 = vld [vmem:[%s4282_s5 + $0x280] sm:$0xff]  ;;  %1832 = vmatpush.bf16.msrb.mxu1 %v3469_v47 }
 0x6c4   : > { %v1471_v52 = vpack.c.bf16 %v1466_v51, %v1465_v50  ;;  %v1463_v60 = vmax.f32 %v1455_v56, 0.0  ;;  %v3493_v50 = vld [vmem:[%s4282_s5 + $0x2c0] sm:$0xff] }
 0x6c5   : > { %1858 = vmatpush.bf16.msra.mxu2 %v3485_v49  ;;  %1871 = vmatpush.bf16.msra.mxu0 %v3493_v50 }
 0x6c7   : > { %v1448_v54 = vpop.f32.mrf.mxu2 }
 0x6c8   : > { %v1459_v63 = vadd.f32 %v1448_v54, %v1074_v59 }
 0x6c9   : > { %v1440_v57 = vpop.f32.mrf.mxu1 }
 0x6ca   : > { %v1456_v58 = vadd.f32 %v1440_v57, %v1066_v55  ;;  %v1467_v5 = vmax.f32 %v1459_v63, 0.0 }
 0x6cc   : > { %v1464_v61 = vmax.f32 %v1456_v58, 0.0 }
 0x6ce   : > { %v1470_v0 = vpack.c.bf16 %v1464_v61, %v1463_v60 }
 0x6cf   : > { %v1450_v1 = vpop.f32.mrf.mxu2 }
 0x6d0   : > { %v1460_v2 = vadd.f32 %v1450_v1, %v1076_v62  ;;  %2940 = vmatmul.msk.bf16.gmra.mxu0 %vm527_vm1, %v1470_v0 }
 0x6d2   : > { %v1468_v6 = vmax.f32 %v1460_v2, 0.0 }
 0x6d4   : > { %v1472_v15 = vpack.c.bf16 %v1468_v6, %v1467_v5 }
 0x6d6   : > { %1540 = vmatpush.bf16.msra.mxu3 %v1472_v15 }
 0x6da   : > { %1541 = vmatpush.bf16.msra.mxu3 %v1471_v52 }
 0x6de   : > { %1542 = vmatpush.bf16.msra.mxu3 %v1470_v0 }
 0x6e0   : > { %2941 = vmatmul.msk.bf16.gmra.mxu0 %vm527_vm1, %v1471_v52 }
 0x6e2   : > { %1543 = vmatpush.bf16.msra.mxu3 %v1469_v46 }
 0x6e5   : > { %2943 = vmatmul.msk.bf16.vlgmr.msra.gmra.mxu3 %vm576_vm2, %v3684_v29 }
 0x6e6   : > { %1838 = vmatpush.bf16.msrb.mxu3 %v3484_v10 }
 0x6ea   : > { %1839 = vmatpush.bf16.msrb.mxu3 %v3483_v22  ;;  %v3561_v22 = vld [vmem:[%s4281_s4 + $0x2] ss:$0 sm:$0xff] }
 0x6ee   : > { %1840 = vmatpush.bf16.msrb.mxu3 %v3482_v24 }
 0x6f0   : > { %2942 = vmatmul.msk.bf16.gmra.mxu0 %vm527_vm1, %v1472_v15 }
 0x6f2   : > { %1841 = vmatpush.bf16.msrb.mxu3 %v3481_v26 }
 0x6f6   : > { %1842 = vmatpush.bf16.msrb.mxu3 %v3480_v31 }
 0x6fa   : > { %1843 = vmatpush.bf16.msrb.mxu3 %v3479_v39 }
 0x6fe   : > { %1844 = vmatpush.bf16.msrb.mxu3 %v3478_v43 }
 0x702   : > { %1845 = vmatpush.bf16.msrb.mxu3 %v3477_v48 }
 0x706   : > { %1971 = vmatpush.bf16.msra.mxu3 %v3502_v12  ;;  %v3515_v12 = vld [vmem:[%s4282_s5 + $0x360] sm:$0xff] }
 0x70a   : > { %1972 = vmatpush.bf16.msra.mxu3 %v3501_v20  ;;  %v3522_v20 = vld [vmem:[%s4282_s5 + $0x398] sm:$0xff] }
 0x73d   : > { %v1516_v54 = vpop.f32.mrf.mxu0 }
 0x73e   : > { %v1517_v23 = vadd.f32 %v3561_v22, %v1516_v54 }
 0x745   : > { %v1518_v55 = vpop.f32.mrf.mxu0 }
 0x746   : > { %v1519_v14 = vadd.f32 %v3561_v22, %v1518_v55 }
 0x74d   : > { %v1521_v56 = vpop.f32.mrf.mxu0 }
 0x74e   : > { %v1522_v28 = vadd.f32 %v3561_v22, %v1521_v56 }
 0x755   : > { %v1523_v57 = vpop.f32.mrf.mxu0 }
 0x756   : > { %v1524_v30 = vadd.f32 %v3561_v22, %v1523_v57 }
 0x75d   : > { %v1526_v58 = vpop.f32.mrf.mxu0 }
 0x75e   : > { %v1527_v42 = vadd.f32 %v3561_v22, %v1526_v58 }
 0x765   : > { %v1528_v59 = vpop.f32.mrf.mxu0 }
 0x766   : > { %v1529_v43 = vadd.f32 %v3561_v22, %v1528_v59 }
 0x768   : > { %v1545_v3 = vpop.f32.mrf.mxu3 }
 0x76d   : > { %v1531_v60 = vpop.f32.mrf.mxu0 }
 0x770   : > { %v1547_v4 = vpop.f32.mrf.mxu3 }
 0x771   : > { %1551 = vrot.lane.b32.xlu2 %v1547_v4, %s3576_s12 }
 0x775   : > { %v1533_v61 = vpop.f32.mrf.mxu0 }
 0x7cb   : > { %v1552_v45 = vpop.permute.xlu2 %1551 }
 0x7cc   : > { %v1554_v46 = vsel %vm527_vm1, %v1545_v3, %v1552_v45 }
 0x7cd   : > { %1556 = vrot.lane.b32.xlu0 %v1554_v46, %s3577_s29 }
 0x83f   : > { %v1557_v51 = vpop.permute.xlu0 %1556 }
 0x840   : > { %v1559_v52 = vsel %vm576_vm2, %v1554_v46, %v1557_v51  ;;  %v1532_v51 = vadd.f32 %v3561_v22, %v1531_v60  ;;  %v3534_v60 = vld [vmem:[%s4282_s5 + $0x3f8] sm:$0xff] }
 0x841   : > { %v3137_v53 = vpack.c.bf16 %v1559_v52, %v1559_v52  ;;  %v1534_v52 = vadd.f32 %v3561_v22, %v1533_v61  ;;  %v3526_v61 = vld [vmem:[%s4282_s5 + $0x3b8] sm:$0xff] }
 0x842   : > { %v3506_v22 = vld [vmem:[%s4282_s5 + $0x318] sm:$0xff] }
 0x843   : > { %3138 = vmatmul.msk.bf16.vlgmr.msrb.gmra.mxu1 %vm3792_vm12, %v3137_v53  ;;  %3141 = vmatmul.msk.bf16.vlgmr.msrb.gmra.mxu3 %vm3797_vm13, %v3137_v53 }
 0x844   : > { %3144 = vmatmul.msk.bf16.vlgmr.msra.gmra.mxu2 %vm3801_vm14, %v3137_v53  ;;  %3147 = vmatmul.msk.bf16.vlgmr.msra.gmra.mxu0 %vm3811_vm4, %v3137_v53 }
 0x845   : > { %2322 = vmatpush.bf16.msrb.mxu3 %v3534_v60 }
 0x8c0   : > { %v1834_v62 = vpop.f32.mrf.mxu1 }
 0x8c1   : > { %v1873_v63 = vpop.f32.mrf.mxu0 }
 0x8c6   : > { %v1847_v0 = vpop.f32.mrf.mxu3 }
 0x8c7   : > { %v1848_v1 = vadd.f32 %v1847_v0, %v1834_v62  ;;  %v1860_v2 = vpop.f32.mrf.mxu2  ;;  %v3533_v0 = vld [vmem:[%s4282_s5 + $0x3f0] sm:$0xff] }
 0x8c8   : > { %v1836_v5 = vpop.f32.mrf.mxu1  ;;  %2323 = vmatpush.bf16.msrb.mxu3 %v3533_v0 }
 0x8c9   : > { %v1861_v6 = vadd.f32 %v1860_v2, %v1848_v1  ;;  %v1875_v15 = vpop.f32.mrf.mxu0  ;;  %v3525_v1 = vld [vmem:[%s4282_s5 + $0x3b0] sm:$0xff] }
 0x8ca   : > { %v3509_v2 = vld [vmem:[%s4282_s5 + $0x330] sm:$0xff]  ;;  %v3524_v15 = vld [vmem:[%s4282_s5 + $0x3a8] sm:$0xff] }
 0x8cb   : > { %v1874_v3 = vadd.f32 %v1873_v63, %v1861_v6  ;;  %v3510_v63 = vld [vmem:[%s4282_s5 + $0x338] sm:$0xff]  ;;  %v3517_v5 = vld [vmem:[%s4282_s5 + $0x370] sm:$0xff]  ;;  %v3532_v6 = vld [vmem:[%s4282_s5 + $0x3e8] sm:$0xff] }
 0x8cc   : > { %2283 = vmatpush.bf16.msrb.mxu0 %v3510_v63  ;;  %2324 = vmatpush.bf16.msrb.mxu3 %v3532_v6 }
 0x8cd   : > { %1878 = vrot.lane.b32.xlu1 %v1874_v3, %s3578_s30 }
 0x8ce   : > { %v1849_v4 = vpop.f32.mrf.mxu3 }
 0x8cf   : > { %v1862_v7 = vpop.f32.mrf.mxu2  ;;  %v3516_v4 = vld [vmem:[%s4282_s5 + $0x368] sm:$0xff] }
 0x8d0   : > { %2284 = vmatpush.bf16.msrb.mxu0 %v3509_v2  ;;  %v3523_v7 = vld [vmem:[%s4282_s5 + $0x3a0] sm:$0xff] }
 0x93f   : > { %v1879_v8 = vpop.permute.xlu1 %1878 }
 0x940   : > { %v1881_v10 = vpack.c.bf16 %v1879_v8, %v1874_v3  ;;  %v3508_v3 = vld [vmem:[%s4282_s5 + $0x328] sm:$0xff]  ;;  %v3531_v8 = vld [vmem:[%s4282_s5 + $0x3e0] sm:$0xff] }
 0x941   : > { %2285 = vmatpush.bf16.msrb.mxu0 %v3508_v3  ;;  %2325 = vmatpush.bf16.msrb.mxu3 %v3531_v8 }
 0x942   : > { %1889 = vmatpush.bf16.msra.mxu1 %v1881_v10  ;;  %v3507_v10 = vld [vmem:[%s4282_s5 + $0x320] sm:$0xff] }
 0x945   : > { %3148 = vmatmul.msk.bf16.vlgmr.msra.gmra.mxu1 %vm953_vm5, %v3825_v34  ;;  %2286 = vmatpush.bf16.msrb.mxu0 %v3507_v10 }
 0x946   : > { %2309 = vmatpush.bf16.msrb.mxu1 %v3526_v61 }
 0x949   : > { %2287 = vmatpush.bf16.msrb.mxu0 %v3506_v22 }
 0x94a   : > { %2310 = vmatpush.bf16.msrb.mxu1 %v3525_v1 }
 0x94e   : > { %2311 = vmatpush.bf16.msrb.mxu1 %v3524_v15 }
 0x952   : > { %2312 = vmatpush.bf16.msrb.mxu1 %v3523_v7 }
 0x955   : > { %3149 = vmatmul.msk.bf16.gmra.mxu1 %vm953_vm5, %v3832_v35 }
 0x956   : > { %2313 = vmatpush.bf16.msrb.mxu1 %v3522_v20 }
 0x965   : > { %3150 = vmatmul.msk.bf16.gmra.mxu1 %vm953_vm5, %v3839_v36 }
 0x975   : > { %3151 = vmatmul.msk.bf16.gmra.mxu1 %vm953_vm5, %v3846_v37 }
 0x9c2   : > { %v1891_v21 = vpop.f32.mrf.mxu1 }
 0x9c3   : > { %v1911_v16 = vadd.f32 %v1891_v21, %v1517_v23  ;;  %v3530_v21 = vld [vmem:[%s4282_s5 + $0x3d8] sm:$0xff] }
 0x9c4   : > { %v3514_v23 = vld [vmem:[%s4282_s5 + $0x358] sm:$0xff]  ;;  %2326 = vmatpush.bf16.msrb.mxu3 %v3530_v21 }
 0x9c5   : > { %v1919_v19 = vmax.f32 %v1911_v16, 0.0  ;;  %v3529_v16 = vld [vmem:[%s4282_s5 + $0x3d0] sm:$0xff] }
 0x9c8   : > { %2327 = vmatpush.bf16.msrb.mxu3 %v3529_v16 }
 0x9ca   : > { %v1893_v24 = vpop.f32.mrf.mxu1 }
 0x9cb   : > { %v1912_v18 = vadd.f32 %v1893_v24, %v1519_v14  ;;  %v3521_v14 = vld [vmem:[%s4282_s5 + $0x390] sm:$0xff] }
 0x9cc   : > { %v3505_v24 = vld [vmem:[%s4282_s5 + $0x310] sm:$0xff]  ;;  %2314 = vmatpush.bf16.msrb.mxu1 %v3521_v14 }
 0x9cd   : > { %v1920_v25 = vmax.f32 %v1912_v18, 0.0  ;;  %v3513_v18 = vld [vmem:[%s4282_s5 + $0x350] sm:$0xff]  ;;  %2288 = vmatpush.bf16.msrb.mxu0 %v3505_v24 }
 0x9cf   : > { %v1927_v26 = vpack.c.bf16 %v1920_v25, %v1919_v19  ;;  %v3520_v19 = vld [vmem:[%s4282_s5 + $0x388] sm:$0xff] }
 0x9d0   : > { %v3528_v25 = vld [vmem:[%s4282_s5 + $0x3c8] sm:$0xff]  ;;  %2315 = vmatpush.bf16.msrb.mxu1 %v3520_v19 }
 0x9d1   : > { %3165 = vmatmul.msk.bf16.vlgmr.msra.gmra.mxu3 %vm527_vm1, %v1927_v26 }
 0x9d2   : > { %v1896_v27 = vpop.f32.mrf.mxu1  ;;  %2328 = vmatpush.bf16.msrb.mxu3 %v3528_v25 }
 0x9d3   : > { %v1913_v31 = vadd.f32 %v1896_v27, %v1522_v28  ;;  %v3512_v27 = vld [vmem:[%s4282_s5 + $0x348] sm:$0xff] }
 0x9d5   : > { %v1921_v38 = vmax.f32 %v1913_v31, 0.0  ;;  %v3503_v31 = vld [vmem:[%s4282_s5 + $0x300] sm:$0xff] }
 0x9da   : > { %v1898_v32 = vpop.f32.mrf.mxu1 }
 0x9db   : > { %v1914_v33 = vadd.f32 %v1898_v32, %v1524_v30  ;;  %v3511_v32 = vld [vmem:[%s4282_s5 + $0x340] sm:$0xff] }
 0x9dd   : > { %v1922_v39 = vmax.f32 %v1914_v33, 0.0  ;;  %v3519_v33 = vld [vmem:[%s4282_s5 + $0x380] sm:$0xff] }
 0x9de   : > { %2316 = vmatpush.bf16.msrb.mxu1 %v3519_v33 }
 0x9df   : > { %v1928_v40 = vpack.c.bf16 %v1922_v39, %v1921_v38  ;;  %v3527_v38 = vld [vmem:[%s4282_s5 + $0x3c0] sm:$0xff] }
 0x9e0   : > { %2329 = vmatpush.bf16.msrb.mxu3 %v3527_v38  ;;  %v3563_v38 = vld [vmem:[#allocation2] ss:$0 sm:$0xff] }
 0x9e1   : > { %3166 = vmatmul.msk.bf16.gmra.mxu3 %vm527_vm1, %v1928_v40 }
 0x9e2   : > { %v1901_v41 = vpop.f32.mrf.mxu1 }
 0x9e3   : > { %v1915_v44 = vadd.f32 %v1901_v41, %v1527_v42 }
 0x9e5   : > { %v1923_v47 = vmax.f32 %v1915_v44, 0.0 }
 0x9ea   : > { %v1903_v45 = vpop.f32.mrf.mxu1 }
 0x9eb   : > { %v1916_v46 = vadd.f32 %v1903_v45, %v1529_v43 }
 0x9ed   : > { %v1924_v48 = vmax.f32 %v1916_v46, 0.0 }
 0x9ef   : > { %v1929_v49 = vpack.c.bf16 %v1924_v48, %v1923_v47 }
 0x9f1   : > { %3167 = vmatmul.msk.bf16.gmra.mxu3 %vm527_vm1, %v1929_v49 }
 0x9f2   : > { %v1906_v50 = vpop.f32.mrf.mxu1 }
 0x9f3   : > { %v1917_v53 = vadd.f32 %v1906_v50, %v1532_v51 }
 0x9f5   : > { %v1925_v56 = vmax.f32 %v1917_v53, 0.0 }
 0x9fa   : > { %v1908_v54 = vpop.f32.mrf.mxu1 }
 0x9fb   : > { %v1918_v55 = vadd.f32 %v1908_v54, %v1534_v52 }
 0x9fd   : > { %v1926_v57 = vmax.f32 %v1918_v55, 0.0 }
 0x9ff   : > { %v1930_v62 = vpack.c.bf16 %v1926_v57, %v1925_v56 }
 0xa01   : > { %3168 = vmatmul.msk.bf16.gmra.mxu3 %vm527_vm1, %v1930_v62  ;;  %1998 = vmatpush.bf16.msrb.mxu2 %v1930_v62 }
 0xa05   : > { %1999 = vmatpush.bf16.msrb.mxu2 %v1929_v49 }
 0xa09   : > { %2000 = vmatpush.bf16.msrb.mxu2 %v1928_v40 }
 0xa0d   : > { %2001 = vmatpush.bf16.msrb.mxu2 %v1927_v26  ;;  %v3504_v26 = vld [vmem:[%s4282_s5 + $0x308] sm:$0xff] }
 0xa0e   : > { %2289 = vmatpush.bf16.msrb.mxu0 %v3504_v26 }
 0xa10   : > { %3169 = vmatmul.msk.bf16.vlgmr.msrb.gmra.mxu2 %vm576_vm2, %v3684_v29  ;;  %v3518_v29 = vld [vmem:[%s4282_s5 + $0x378] sm:$0xff] }
 0xa11   : > { %2296 = vmatpush.bf16.msra.mxu2 %v3518_v29 }
 0xa12   : > { %2290 = vmatpush.bf16.msrb.mxu0 %v3503_v31 }
 0xa15   : > { %2297 = vmatpush.bf16.msra.mxu2 %v3517_v5 }
 0xa19   : > { %2298 = vmatpush.bf16.msra.mxu2 %v3516_v4 }
 0xa1d   : > { %2299 = vmatpush.bf16.msra.mxu2 %v3515_v12 }
 0xa21   : > { %2300 = vmatpush.bf16.msra.mxu2 %v3514_v23 }
 0xa25   : > { %2301 = vmatpush.bf16.msra.mxu2 %v3513_v18 }
 0xa29   : > { %2302 = vmatpush.bf16.msra.mxu2 %v3512_v27 }
 0xa2d   : > { %2303 = vmatpush.bf16.msra.mxu2 %v3511_v32 }
 0xa54   : > { %v1974_v42 = vpop.f32.mrf.mxu3 }
 0xa5c   : > { %v1976_v43 = vpop.f32.mrf.mxu3 }
 0xa64   : > { %v1979_v44 = vpop.f32.mrf.mxu3 }
 0xa6c   : > { %v1981_v45 = vpop.f32.mrf.mxu3 }
 0xa74   : > { %v1984_v46 = vpop.f32.mrf.mxu3 }
 0xa7c   : > { %v1986_v47 = vpop.f32.mrf.mxu3 }
 0xa84   : > { %v1989_v48 = vpop.f32.mrf.mxu3 }
 0xa8c   : > { %v1991_v49 = vpop.f32.mrf.mxu3 }
 0xa93   : > { %v2003_v58 = vpop.f32.mrf.mxu2 }
 0xa9b   : > { %v2005_v59 = vpop.f32.mrf.mxu2 }
 0xa9c   : > { %2009 = vrot.lane.b32.xlu2 %v2005_v59, %s3576_s12  ;;  %v3535_v59 = vld [vmem:[%s4285_s8] sm:$0xff] }
 0xaf6   : > { %v2010_v28 = vpop.permute.xlu2 %2009 }
 0xaf7   : > { %v2012_v30 = vsel %vm527_vm1, %v2003_v58, %v2010_v28  ;;  %v3536_v58 = vld [vmem:[%s4285_s8 + $0x8] sm:$0xff] }
 0xaf8   : > { %2014 = vrot.lane.b32.xlu0 %v2012_v30, %s3577_s29  ;;  %2427 = vmatpush.bf16.msrb.mxu2 %v3536_v58 }
 0xafc   : > { %2428 = vmatpush.bf16.msrb.mxu2 %v3535_v59 }
 0xb6a   : > { %v2015_v39 = vpop.permute.xlu0 %2014 }
 0xb6b   : > { %v2017_v40 = vsel %vm576_vm2, %v2012_v30, %v2015_v39  ;;  %vm2450_vm2 = vcmask 7168  }
 0xb6c   : > { %v3363_v41 = vpack.c.bf16 %v2017_v40, %v2017_v40 }
 0xb6e   : > { %3364 = vmatmul.msk.bf16.vlgmr.msrb.gmra.mxu0 %vm3792_vm12, %v3363_v41  ;;  %3367 = vmatmul.msk.bf16.vlgmr.msra.gmra.mxu2 %vm3797_vm13, %v3363_v41 }
 0xb6f   : > { %3370 = vmatmul.msk.bf16.vlgmr.msrb.gmra.mxu1 %vm3801_vm14, %v3363_v41  ;;  %3373 = vmatmul.msk.bf16.vlgmr.msrb.gmra.mxu3 %vm3811_vm4, %v3363_v41 }
 0xbeb   : > { %v2292_v50 = vpop.f32.mrf.mxu0 }
 0xbec   : > { %v2318_v9 = vpop.f32.mrf.mxu1 }
 0xbf1   : > { %v2305_v51 = vpop.f32.mrf.mxu2 }
 0xbf2   : > { %v2306_v52 = vadd.f32 %v2305_v51, %v2292_v50  ;;  %v2331_v17 = vpop.f32.mrf.mxu3 }
 0xbf3   : > { %v2294_v53 = vpop.f32.mrf.mxu0 }
 0xbf4   : > { %v2319_v54 = vadd.f32 %v2318_v9, %v2306_v52  ;;  %v2320_v11 = vpop.f32.mrf.mxu1 }
 0xbf6   : > { %v2332_v55 = vadd.f32 %v2331_v17, %v2319_v54 }
 0xbf8   : > { %2336 = vrot.lane.b32.xlu1 %v2332_v55, %s3578_s30 }
 0xbf9   : > { %v2307_v13 = vpop.f32.mrf.mxu2 }
 0xbfa   : > { %v2333_v56 = vpop.f32.mrf.mxu3 }
 0xc6a   : > { %v2337_v57 = vpop.permute.xlu1 %2336 }
 0xc6b   : > { %v2339_v62 = vpack.c.bf16 %v2337_v57, %v2332_v55 }
 0xc6d   : > { %2347 = vmatpush.bf16.msra.mxu0 %v2339_v62 }
 0xc70   : > { %3374 = vmatmul.msk.bf16.vlgmr.msra.gmra.mxu0 %vm953_vm5, %v3825_v34 }
 0xc80   : > { %3375 = vmatmul.msk.bf16.gmra.mxu0 %vm953_vm5, %v3832_v35  ;;  %v3562_v35 = vld [vmem:[%s4281_s4 + $0x3] ss:$0 sm:$0xff] }
 0xc81   : > { %v1975_v60 = vadd.f32 %v3562_v35, %v1974_v42  ;;  %v1980_v5 = vadd.f32 %v3562_v35, %v1979_v44  ;;  %v1982_v6 = vadd.f32 %v3562_v35, %v1981_v45  ;;  %v1985_v20 = vadd.f32 %v3562_v35, %v1984_v46 }
 0xc82   : > { %v1987_v21 = vadd.f32 %v3562_v35, %v1986_v47  ;;  %v1990_v25 = vadd.f32 %v3562_v35, %v1989_v48  ;;  %v1992_v26 = vadd.f32 %v3562_v35, %v1991_v49 }
 0xc90   : > { %3376 = vmatmul.msk.bf16.gmra.mxu0 %vm953_vm5, %v3839_v36  ;;  %v1977_v36 = vadd.f32 %v3562_v35, %v1976_v43 }
 0xca0   : > { %3377 = vmatmul.msk.bf16.gmra.mxu0 %vm953_vm5, %v3846_v37 }
 0xced   : > { %v2349_v34 = vpop.f32.mrf.mxu0 }
 0xcee   : > { %v2369_v61 = vadd.f32 %v2349_v34, %v1975_v60 }
 0xcf0   : > { %v2377_v29 = vmax.f32 %v2369_v61, 0.0 }
 0xcf5   : > { %v2351_v63 = vpop.f32.mrf.mxu0 }
 0xcf6   : > { %v2370_v37 = vadd.f32 %v2351_v63, %v1977_v36 }
 0xcf8   : > { %v2378_v0 = vmax.f32 %v2370_v37, 0.0 }
 0xcfa   : > { %v2385_v1 = vpack.c.bf16 %v2378_v0, %v2377_v29 }
 0xcfc   : > { %3386 = vmatmul.msk.bf16.vlgmr.msrb.gmra.mxu2 %vm527_vm1, %v2385_v1 }
 0xcfd   : > { %v2354_v2 = vpop.f32.mrf.mxu0 }
 0xcfe   : > { %v2371_v15 = vadd.f32 %v2354_v2, %v1980_v5 }
 0xd00   : > { %v2379_v7 = vmax.f32 %v2371_v15, 0.0 }
 0xd05   : > { %v2356_v3 = vpop.f32.mrf.mxu0 }
 0xd06   : > { %v2372_v4 = vadd.f32 %v2356_v3, %v1982_v6 }
 0xd08   : > { %v2380_v8 = vmax.f32 %v2372_v4, 0.0 }
 0xd0a   : > { %v2386_v10 = vpack.c.bf16 %v2380_v8, %v2379_v7 }
 0xd0c   : > { %3387 = vmatmul.msk.bf16.gmra.mxu2 %vm527_vm1, %v2386_v10 }
 0xd0d   : > { %v2359_v12 = vpop.f32.mrf.mxu0 }
 0xd0e   : > { %v2373_v22 = vadd.f32 %v2359_v12, %v1985_v20 }
 0xd10   : > { %v2381_v16 = vmax.f32 %v2373_v22, 0.0 }
 0xd15   : > { %v2361_v23 = vpop.f32.mrf.mxu0 }
 0xd16   : > { %v2374_v14 = vadd.f32 %v2361_v23, %v1987_v21 }
 0xd18   : > { %v2382_v24 = vmax.f32 %v2374_v14, 0.0 }
 0xd1a   : > { %v2387_v18 = vpack.c.bf16 %v2382_v24, %v2381_v16 }
 0xd1c   : > { %3388 = vmatmul.msk.bf16.gmra.mxu2 %vm527_vm1, %v2387_v18 }
 0xd1d   : > { %v2364_v19 = vpop.f32.mrf.mxu0 }
 0xd1e   : > { %v2375_v27 = vadd.f32 %v2364_v19, %v1990_v25 }
 0xd20   : > { %v2383_v31 = vmax.f32 %v2375_v27, 0.0 }
 0xd25   : > { %v2366_v28 = vpop.f32.mrf.mxu0 }
 0xd26   : > { %v2376_v30 = vadd.f32 %v2366_v28, %v1992_v26 }
 0xd28   : > { %v2384_v32 = vmax.f32 %v2376_v30, 0.0 }
 0xd2a   : > { %v2388_v33 = vpack.c.bf16 %v2384_v32, %v2383_v31 }
 0xd2c   : > { %3389 = vmatmul.msk.bf16.gmra.mxu2 %vm527_vm1, %v2388_v33 }
 0xd7f   : > { %v2430_v39 = vpop.f32.mrf.mxu2 }
 0xd80   : > { %v2431_v40 = vadd.f32 %v3563_v38, %v2430_v39 }
 0xd82   : > { %2451 = vst.msk [vmem:[%s361_s24] sm:$0xff] %vm2450_vm2, %v2431_v40 }
 0xd87   : > { %v2432_v41 = vpop.f32.mrf.mxu2 }
 0xd88   : > { %v2433_v42 = vadd.f32 %v3563_v38, %v2432_v41 }
 0xd8a   : > { %2452 = vst.msk [vmem:[%s361_s24 + $0x8] sm:$0xff] %vm2450_vm2, %v2433_v42 }
 0xd8f   : > { %v2435_v43 = vpop.f32.mrf.mxu2 }
 0xd90   : > { %v2436_v44 = vadd.f32 %v3563_v38, %v2435_v43 }
 0xd92   : > { %2453 = vst.msk [vmem:[%s361_s24 + $0x10] sm:$0xff] %vm2450_vm2, %v2436_v44 }
 0xd97   : > { %v2437_v45 = vpop.f32.mrf.mxu2 }
 0xd98   : > { %v2438_v46 = vadd.f32 %v3563_v38, %v2437_v45 }
 0xd9a   : > { %2454 = vst.msk [vmem:[%s361_s24 + $0x18] sm:$0xff] %vm2450_vm2, %v2438_v46 }
 0xd9f   : > { %v2440_v47 = vpop.f32.mrf.mxu2 }
 0xda0   : > { %v2441_v48 = vadd.f32 %v3563_v38, %v2440_v47 }
 0xda2   : > { %2455 = vst.msk [vmem:[%s361_s24 + $0x20] sm:$0xff] %vm2450_vm2, %v2441_v48 }
 0xda7   : > { %v2442_v49 = vpop.f32.mrf.mxu2 }
 0xda8   : > { %v2443_v50 = vadd.f32 %v3563_v38, %v2442_v49 }
 0xdaa   : > { %2456 = vst.msk [vmem:[%s361_s24 + $0x28] sm:$0xff] %vm2450_vm2, %v2443_v50 }
 0xdaf   : > { %v2445_v9 = vpop.f32.mrf.mxu2 }
 0xdb0   : > { %v2446_v51 = vadd.f32 %v3563_v38, %v2445_v9 }
 0xdb2   : > { %2457 = vst.msk [vmem:[%s361_s24 + $0x30] sm:$0xff] %vm2450_vm2, %v2446_v51 }
 0xdb7   : > { %v2447_v52 = vpop.f32.mrf.mxu2 }
 0xdb8   : > { %v2448_v17 = vadd.f32 %v3563_v38, %v2447_v52 }
 0xdba   : > { %2458 = vst.msk [vmem:[%s361_s24 + $0x38] sm:$0xff] %vm2450_vm2, %v2448_v17 }
 0xdbb PF: > { %s22_s15 = sadd.s32 1, %s3572_s15  }
 0xdbc   : > { %p19_p4 = scmp.ge.s32.totalorder %s22_s15, 4  }
 0xdbe   :  { %21 = sbr.rel (!%p19_p4) target bundleno = 3 (0x3), region = 99 }

</bundles_post_ra>
